<compile_context>
chip_gen: v5e
topology: v5e:2x2
jax: 0.10.0
libtpu: 0.0.40
codegen_flags: <defaults>
</compile_context>

<pallas_src>
from functools import partial

import jax
import jax.numpy as jnp
from jax.experimental import pallas as pl
from jax.experimental.pallas import tpu as pltpu


# ---------------------------------------------------------------------------
# Pallas kernels
# ---------------------------------------------------------------------------

def _ecg_fused_kernel(patch_ref, cond_ref, pe_w_ref, pe_b_ref,
                      cond_w_ref, head_w_ref, head_b_ref, o_ref):
    # Fused: mean-pool over patches (f32), patch-embed (bf16 MXU, f32 acc),
    # conditioning injection, projection head.  Token tensor never built.
    p = patch_ref[...].astype(jnp.float32)                        # (bb, N, Pdim)
    pooled = jnp.mean(p, axis=1)                                  # (bb, Pdim)
    emb = jnp.dot(pooled.astype(jnp.bfloat16), pe_w_ref[...],
                  preferred_element_type=jnp.float32) + pe_b_ref[...]     # (bb, E)
    emb = emb + jnp.dot(cond_ref[...].astype(jnp.bfloat16), cond_w_ref[...],
                        preferred_element_type=jnp.float32)
    o_ref[...] = (jnp.dot(emb.astype(jnp.bfloat16), head_w_ref[...],
                          preferred_element_type=jnp.float32)
                  + head_b_ref[...])                              # (bb, L)


def _cmr_fused_kernel(patch_ref, pe_w_ref, pe_b_ref, head_w_ref, head_b_ref,
                      o_ref):
    p = patch_ref[...].astype(jnp.float32)                        # (bb, N, Pdim)
    pooled = jnp.mean(p, axis=1)                                  # (bb, Pdim)
    emb = jnp.dot(pooled.astype(jnp.bfloat16), pe_w_ref[...],
                  preferred_element_type=jnp.float32) + pe_b_ref[...]
    o_ref[...] = (jnp.dot(emb.astype(jnp.bfloat16), head_w_ref[...],
                          preferred_element_type=jnp.float32)
                  + head_b_ref[...])


def _clip_loss_kernel(inv_t_ref, ze_ref, zc_ref, o_ref):
    # Symmetric InfoNCE (CLIP) loss, fully on-chip.
    inv_t = inv_t_ref[0, 0]                                       # SMEM scalar
    ze = ze_ref[...]                                              # (B, L) f32
    zc = zc_ref[...]
    ze = ze * jax.lax.rsqrt(jnp.sum(ze * ze, axis=-1, keepdims=True) + 1e-12)
    zc = zc * jax.lax.rsqrt(jnp.sum(zc * zc, axis=-1, keepdims=True) + 1e-12)

    # ze @ zc^T without materializing a transpose: contract the last dims.
    logits = jax.lax.dot_general(
        ze, zc, dimension_numbers=(((1,), (1,)), ((), ())),
        preferred_element_type=jnp.float32) * inv_t               # (B, B)

    # Positive-pair logits computed directly (no (B,B) iota diag mask).
    diag = jnp.sum(ze * zc, axis=-1, keepdims=True) * inv_t       # (B, 1)

    B = logits.shape[0]
    m_r = jnp.max(logits, axis=1, keepdims=True)
    lse_r = m_r + jnp.log(jnp.sum(jnp.exp(logits - m_r), axis=1, keepdims=True))
    m_c = jnp.max(logits, axis=0, keepdims=True)
    lse_c = m_c + jnp.log(jnp.sum(jnp.exp(logits - m_c), axis=0, keepdims=True))

    loss_i2t = (jnp.sum(lse_r) - jnp.sum(diag)) / B
    loss_t2i = (jnp.sum(lse_c) - jnp.sum(diag)) / B
    o_ref[...] = jnp.reshape(0.5 * (loss_i2t + loss_t2i), (1, 1))


# ---------------------------------------------------------------------------
# Wrappers (pallas_call plumbing)
# ---------------------------------------------------------------------------

def _batch_block(B):
    # Batch-block size: 8 sublane-aligned rows when possible, else whole batch.
    return 8 if B % 8 == 0 else B


def im2col(x, ph, pw):
    # NCHW -> (B, num_patches, C*ph*pw).
    # TODO(synk): for large H*W this transpose is an extra HBM pass; fold the
    # patch gather into the BlockSpec index_map when scaling up.
    B, C, H, W = x.shape
    x = x.reshape(B, C, H // ph, ph, W // pw, pw)
    x = x.transpose(0, 2, 4, 1, 3, 5)
    return x.reshape(B, (H // ph) * (W // pw), C * ph * pw)


def ecg_encoder(params, ecg, cond, ecg_patch):
    ph, pw = ecg_patch
    patches = im2col(ecg, ph, pw)                                 # (B, N, Pdim) f32
    B, N, Pdim = patches.shape
    E = params["ecg_pe_w"].shape[1]
    L = params["ecg_head_w"].shape[1]
    Cd = cond.shape[1]
    bb = _batch_block(B)

    feat = pl.pallas_call(
        _ecg_fused_kernel,
        out_shape=jax.ShapeDtypeStruct((B, L), jnp.float32),
        grid=(B // bb,),
        in_specs=[
            pl.BlockSpec((bb, N, Pdim), lambda i: (i, 0, 0)),
            pl.BlockSpec((bb, Cd), lambda i: (i, 0)),
            pl.BlockSpec((Pdim, E), lambda i: (0, 0)),
            pl.BlockSpec((1, E), lambda i: (0, 0)),
            pl.BlockSpec((Cd, E), lambda i: (0, 0)),
            pl.BlockSpec((E, L), lambda i: (0, 0)),
            pl.BlockSpec((1, L), lambda i: (0, 0)),
        ],
        out_specs=pl.BlockSpec((bb, L), lambda i: (i, 0)),
        compiler_params=pltpu.CompilerParams(
            dimension_semantics=("parallel",)),
    )(
        patches,
        cond,
        params["ecg_pe_w"].astype(jnp.bfloat16),
        params["ecg_pe_b"].reshape(1, E),
        params["ecg_cond_w"].astype(jnp.bfloat16),
        params["ecg_head_w"].astype(jnp.bfloat16),
        params["ecg_head_b"].reshape(1, L),
    )
    # TODO(synk): ecg_inter (the (B, N, E) per-token tensor) is intentionally not
    # materialized: ECCL_single.forward() never consumes it, and folding the
    # mean-pool into the patch matmul avoids its HBM round trip.
    return feat


def cmr_encoder(params, cmr, cmr_patch):
    ph, pw = cmr_patch
    patches = im2col(cmr, ph, pw)                                 # (B, N, Pdim) f32
    B, N, Pdim = patches.shape
    E = params["cmr_pe_w"].shape[1]
    L = params["cmr_head_w"].shape[1]
    bb = _batch_block(B)

    return pl.pallas_call(
        _cmr_fused_kernel,
        out_shape=jax.ShapeDtypeStruct((B, L), jnp.float32),
        grid=(B // bb,),
        in_specs=[
            pl.BlockSpec((bb, N, Pdim), lambda i: (i, 0, 0)),
            pl.BlockSpec((Pdim, E), lambda i: (0, 0)),
            pl.BlockSpec((1, E), lambda i: (0, 0)),
            pl.BlockSpec((E, L), lambda i: (0, 0)),
            pl.BlockSpec((1, L), lambda i: (0, 0)),
        ],
        out_specs=pl.BlockSpec((bb, L), lambda i: (i, 0)),
        compiler_params=pltpu.CompilerParams(
            dimension_semantics=("parallel",)),
    )(
        patches,
        params["cmr_pe_w"].astype(jnp.bfloat16),
        params["cmr_pe_b"].reshape(1, E),
        params["cmr_head_w"].astype(jnp.bfloat16),
        params["cmr_head_b"].reshape(1, L),
    )


def clip_loss(z_ecg, z_cmr, temperature):
    B, L = z_ecg.shape
    inv_t = jnp.reshape(
        (1.0 / jnp.asarray(temperature, jnp.float32)).astype(jnp.float32), (1, 1))
    out = pl.pallas_call(
        _clip_loss_kernel,
        out_shape=jax.ShapeDtypeStruct((1, 1), jnp.float32),
        grid=(1,),
        in_specs=[
            pl.BlockSpec(memory_space=pltpu.MemorySpace.SMEM),
            pl.BlockSpec((B, L), lambda i: (0, 0)),
            pl.BlockSpec((B, L), lambda i: (0, 0)),
        ],
        out_specs=pl.BlockSpec((1, 1), lambda i: (0, 0)),
    )(inv_t, z_ecg, z_cmr)
    return out[0, 0]


# ---------------------------------------------------------------------------
# Module wiring (mirrors ECCL_single.forward)
# ---------------------------------------------------------------------------

def eccl_single_forward(params, ecg, cmr, cmr_la, cond, temperature,
                        *, ecg_patch=(1, 16), cmr_patch=(4, 4),
                        CL_which_cmr="cmr"):
    ecg_feature = ecg_encoder(params, ecg, cond, ecg_patch)
    if CL_which_cmr == "cmr":
        cmr_feature = jax.lax.stop_gradient(
            cmr_encoder(params, cmr, cmr_patch))                  # torch.no_grad()
        return {"loss_ecgcmr": clip_loss(ecg_feature, cmr_feature, temperature)}
    elif CL_which_cmr == "cmr_la":
        cmr_feature = jax.lax.stop_gradient(
            cmr_encoder(params, cmr_la, cmr_patch))
        return {"loss_ecglacmr": clip_loss(ecg_feature, cmr_feature, temperature)}
    else:
        raise ValueError("CL_which_cmr should be cmr or cmr_la")


def init_params(key, *, ecg_patch=(1, 16), ecg_in_chans=1, ecg_embed=128,
                cmr_patch=(4, 4), cmr_in_chans=1, cmr_embed=128,
                cond_dim=8, latent_dim=128):
    # embed / latent dims padded to 128 so kernel outputs are lane-dense.
    ks = jax.random.split(key, 8)
    ecg_pdim = ecg_in_chans * ecg_patch[0] * ecg_patch[1]
    cmr_pdim = cmr_in_chans * cmr_patch[0] * cmr_patch[1]
    s = 0.02
    return {
        "ecg_pe_w": s * jax.random.normal(ks[0], (ecg_pdim, ecg_embed), jnp.float32),
        "ecg_pe_b": jnp.zeros((ecg_embed,), jnp.float32),
        "ecg_cond_w": s * jax.random.normal(ks[1], (cond_dim, ecg_embed), jnp.float32),
        "ecg_head_w": s * jax.random.normal(ks[2], (ecg_embed, latent_dim), jnp.float32),
        "ecg_head_b": jnp.zeros((latent_dim,), jnp.float32),
        "cmr_pe_w": s * jax.random.normal(ks[3], (cmr_pdim, cmr_embed), jnp.float32),
        "cmr_pe_b": jnp.zeros((cmr_embed,), jnp.float32),
        "cmr_head_w": s * jax.random.normal(ks[4], (cmr_embed, latent_dim), jnp.float32),
        "cmr_head_b": jnp.zeros((latent_dim,), jnp.float32),
    }


if __name__ == "__main__":
    key = jax.random.PRNGKey(0)
    k_ecg, k_cmr, k_la, k_cond, k_par = jax.random.split(key, 5)

    B = 16
    ecg = jax.random.normal(k_ecg, (B, 1, 12, 128), jnp.float32)   # NCHW, patch (1,16)
    cmr = jax.random.normal(k_cmr, (B, 1, 32, 32), jnp.float32)    # NCHW, patch (4,4)
    cmr_la = jax.random.normal(k_la, (B, 1, 32, 32), jnp.float32)
    cond = jax.random.normal(k_cond, (B, 8), jnp.float32)

    params = init_params(k_par)

    fwd = jax.jit(partial(eccl_single_forward,
                          ecg_patch=(1, 16), cmr_patch=(4, 4),
                          CL_which_cmr="cmr"))
    loss = fwd(params, ecg, cmr, cmr_la, cond, jnp.float32(0.1))
    jax.block_until_ready(loss["loss_ecgcmr"])
    assert jnp.isfinite(loss["loss_ecgcmr"])
    print("KERNEL_OK")
</pallas_src>

<mosaic_0001>
module attributes {stable_mosaic.version = 11 : i64} {
  func.func @_cmr_fused_kernel(%arg0: i32, %arg1: memref<8x64x16xf32, #tpu.memory_space<vmem>>, %arg2: memref<16x128xbf16, #tpu.memory_space<vmem>>, %arg3: memref<1x128xf32, #tpu.memory_space<vmem>>, %arg4: memref<128x128xbf16, #tpu.memory_space<vmem>>, %arg5: memref<1x128xf32, #tpu.memory_space<vmem>>, %arg6: memref<8x128xf32, #tpu.memory_space<vmem>>) attributes {dimension_semantics = [#tpu.dimension_semantics<parallel>], iteration_bounds = array<i64: 2>, scalar_prefetch = 0 : i64, scratch_operands = 0 : i64, tpu.core_type = #tpu.core_type<tc>, window_params = [{transform_indices = @transform_0, window_bounds = array<i64: 8, 64, 16>}, {pipeline_mode = #tpu.pipeline_mode<synchronous>, transform_indices = @transform_1, window_bounds = array<i64: 16, 128>}, {pipeline_mode = #tpu.pipeline_mode<synchronous>, transform_indices = @transform_2, window_bounds = array<i64: 1, 128>}, {pipeline_mode = #tpu.pipeline_mode<synchronous>, transform_indices = @transform_3, window_bounds = array<i64: 128, 128>}, {pipeline_mode = #tpu.pipeline_mode<synchronous>, transform_indices = @transform_4, window_bounds = array<i64: 1, 128>}, {transform_indices = @transform_5, window_bounds = array<i64: 8, 128>}]} {
    %c0 = arith.constant 0 : index
    %c0_0 = arith.constant 0 : index
    %c0_1 = arith.constant 0 : index
    %0 = vector.load %arg1[%c0, %c0_0, %c0_1] : memref<8x64x16xf32, #tpu.memory_space<vmem>>, vector<8x64x16xf32>
    %cst = arith.constant dense<0.000000e+00> : vector<8x16xf32>
    %1 = vector.multi_reduction <add>, %0, %cst [1] : vector<8x64x16xf32> to vector<8x16xf32>
    %cst_2 = arith.constant 6.400000e+01 : f32
    %2 = vector.broadcast %cst_2 : f32 to vector<8x16xf32>
    %3 = arith.divf %1, %2 : vector<8x16xf32>
    %4 = arith.truncf %3 : vector<8x16xf32> to vector<8x16xbf16>
    %c0_3 = arith.constant 0 : index
    %c0_4 = arith.constant 0 : index
    %5 = vector.load %arg2[%c0_3, %c0_4] : memref<16x128xbf16, #tpu.memory_space<vmem>>, vector<16x128xbf16>
    %cst_5 = arith.constant dense<0.000000e+00> : vector<8x128xf32>
    %6 = tpu.matmul %4, %5, %cst_5 {dimension_numbers = #tpu.dot_dimension_numbers<[1], [0], [0], [1], [0, 0, 1, 1], [], []>} : vector<8x16xbf16>, vector<16x128xbf16>, vector<8x128xf32> -> vector<8x128xf32>
    %c0_6 = arith.constant 0 : index
    %c0_7 = arith.constant 0 : index
    %7 = vector.load %arg3[%c0_6, %c0_7] : memref<1x128xf32, #tpu.memory_space<vmem>>, vector<1x128xf32>
    %8 = vector.broadcast %7 : vector<1x128xf32> to vector<8x128xf32>
    %9 = arith.addf %6, %8 : vector<8x128xf32>
    %10 = arith.truncf %9 : vector<8x128xf32> to vector<8x128xbf16>
    %c0_8 = arith.constant 0 : index
    %c0_9 = arith.constant 0 : index
    %11 = vector.load %arg4[%c0_8, %c0_9] : memref<128x128xbf16, #tpu.memory_space<vmem>>, vector<128x128xbf16>
    %cst_10 = arith.constant dense<0.000000e+00> : vector<8x128xf32>
    %12 = tpu.matmul %10, %11, %cst_10 {dimension_numbers = #tpu.dot_dimension_numbers<[1], [0], [0], [1], [0, 0, 1, 1], [], []>} : vector<8x128xbf16>, vector<128x128xbf16>, vector<8x128xf32> -> vector<8x128xf32>
    %c0_11 = arith.constant 0 : index
    %c0_12 = arith.constant 0 : index
    %13 = vector.load %arg5[%c0_11, %c0_12] : memref<1x128xf32, #tpu.memory_space<vmem>>, vector<1x128xf32>
    %14 = vector.broadcast %13 : vector<1x128xf32> to vector<8x128xf32>
    %15 = arith.addf %12, %14 : vector<8x128xf32>
    %c0_13 = arith.constant 0 : index
    %c0_14 = arith.constant 0 : index
    %16 = vector.load %arg6[%c0_13, %c0_14] : memref<8x128xf32, #tpu.memory_space<vmem>>, vector<8x128xf32>
    tpu.vector_store %arg6[%c0_13, %c0_14], %15 {strides = array<i32>} : memref<8x128xf32, #tpu.memory_space<vmem>>, vector<8x128xf32>,
    return
  }
  func.func @transform_0(%arg0: i32) -> (i32, i32, i32) {
    %c0_i32 = arith.constant 0 : i32
    %c0_i32_0 = arith.constant 0 : i32
    %c0_i32_1 = arith.constant 0 : i32
    return %arg0, %c0_i32, %c0_i32_0 : i32, i32, i32
  }
  func.func @transform_1(%arg0: i32) -> (i32, i32) {
    %c0_i32 = arith.constant 0 : i32
    %c0_i32_0 = arith.constant 0 : i32
    %c0_i32_1 = arith.constant 0 : i32
    return %c0_i32, %c0_i32_0 : i32, i32
  }
  func.func @transform_2(%arg0: i32) -> (i32, i32) {
    %c0_i32 = arith.constant 0 : i32
    %c0_i32_0 = arith.constant 0 : i32
    %c0_i32_1 = arith.constant 0 : i32
    return %c0_i32, %c0_i32_0 : i32, i32
  }
  func.func @transform_3(%arg0: i32) -> (i32, i32) {
    %c0_i32 = arith.constant 0 : i32
    %c0_i32_0 = arith.constant 0 : i32
    %c0_i32_1 = arith.constant 0 : i32
    return %c0_i32, %c0_i32_0 : i32, i32
  }
  func.func @transform_4(%arg0: i32) -> (i32, i32) {
    %c0_i32 = arith.constant 0 : i32
    %c0_i32_0 = arith.constant 0 : i32
    %c0_i32_1 = arith.constant 0 : i32
    return %c0_i32, %c0_i32_0 : i32, i32
  }
  func.func @transform_5(%arg0: i32) -> (i32, i32) {
    %c0_i32 = arith.constant 0 : i32
    %c0_i32_0 = arith.constant 0 : i32
    return %arg0, %c0_i32 : i32, i32
  }
}

module attributes {stable_mosaic.version = 11 : i64} {
  func.func @_ecg_fused_kernel(%arg0: i32, %arg1: memref<8x96x16xf32, #tpu.memory_space<vmem>>, %arg2: memref<8x8xf32, #tpu.memory_space<vmem>>, %arg3: memref<16x128xbf16, #tpu.memory_space<vmem>>, %arg4: memref<1x128xf32, #tpu.memory_space<vmem>>, %arg5: memref<8x128xbf16, #tpu.memory_space<vmem>>, %arg6: memref<128x128xbf16, #tpu.memory_space<vmem>>, %arg7: memref<1x128xf32, #tpu.memory_space<vmem>>, %arg8: memref<8x128xf32, #tpu.memory_space<vmem>>) attributes {dimension_semantics = [#tpu.dimension_semantics<parallel>], iteration_bounds = array<i64: 2>, scalar_prefetch = 0 : i64, scratch_operands = 0 : i64, tpu.core_type = #tpu.core_type<tc>, window_params = [{transform_indices = @transform_0, window_bounds = array<i64: 8, 96, 16>}, {transform_indices = @transform_1, window_bounds = array<i64: 8, 8>}, {pipeline_mode = #tpu.pipeline_mode<synchronous>, transform_indices = @transform_2, window_bounds = array<i64: 16, 128>}, {pipeline_mode = #tpu.pipeline_mode<synchronous>, transform_indices = @transform_3, window_bounds = array<i64: 1, 128>}, {pipeline_mode = #tpu.pipeline_mode<synchronous>, transform_indices = @transform_4, window_bounds = array<i64: 8, 128>}, {pipeline_mode = #tpu.pipeline_mode<synchronous>, transform_indices = @transform_5, window_bounds = array<i64: 128, 128>}, {pipeline_mode = #tpu.pipeline_mode<synchronous>, transform_indices = @transform_6, window_bounds = array<i64: 1, 128>}, {transform_indices = @transform_7, window_bounds = array<i64: 8, 128>}]} {
    %c0 = arith.constant 0 : index
    %c0_0 = arith.constant 0 : index
    %c0_1 = arith.constant 0 : index
    %0 = vector.load %arg1[%c0, %c0_0, %c0_1] : memref<8x96x16xf32, #tpu.memory_space<vmem>>, vector<8x96x16xf32>
    %cst = arith.constant dense<0.000000e+00> : vector<8x16xf32>
    %1 = vector.multi_reduction <add>, %0, %cst [1] : vector<8x96x16xf32> to vector<8x16xf32>
    %cst_2 = arith.constant 9.600000e+01 : f32
    %2 = vector.broadcast %cst_2 : f32 to vector<8x16xf32>
    %3 = arith.divf %1, %2 : vector<8x16xf32>
    %4 = arith.truncf %3 : vector<8x16xf32> to vector<8x16xbf16>
    %c0_3 = arith.constant 0 : index
    %c0_4 = arith.constant 0 : index
    %5 = vector.load %arg3[%c0_3, %c0_4] : memref<16x128xbf16, #tpu.memory_space<vmem>>, vector<16x128xbf16>
    %cst_5 = arith.constant dense<0.000000e+00> : vector<8x128xf32>
    %6 = tpu.matmul %4, %5, %cst_5 {dimension_numbers = #tpu.dot_dimension_numbers<[1], [0], [0], [1], [0, 0, 1, 1], [], []>} : vector<8x16xbf16>, vector<16x128xbf16>, vector<8x128xf32> -> vector<8x128xf32>
    %c0_6 = arith.constant 0 : index
    %c0_7 = arith.constant 0 : index
    %7 = vector.load %arg4[%c0_6, %c0_7] : memref<1x128xf32, #tpu.memory_space<vmem>>, vector<1x128xf32>
    %8 = vector.broadcast %7 : vector<1x128xf32> to vector<8x128xf32>
    %9 = arith.addf %6, %8 : vector<8x128xf32>
    %c0_8 = arith.constant 0 : index
    %c0_9 = arith.constant 0 : index
    %10 = vector.load %arg2[%c0_8, %c0_9] : memref<8x8xf32, #tpu.memory_space<vmem>>, vector<8x8xf32>
    %11 = arith.truncf %10 : vector<8x8xf32> to vector<8x8xbf16>
    %c0_10 = arith.constant 0 : index
    %c0_11 = arith.constant 0 : index
    %12 = vector.load %arg5[%c0_10, %c0_11] : memref<8x128xbf16, #tpu.memory_space<vmem>>, vector<8x128xbf16>
    %cst_12 = arith.constant dense<0.000000e+00> : vector<8x128xf32>
    %13 = tpu.matmul %11, %12, %cst_12 {dimension_numbers = #tpu.dot_dimension_numbers<[1], [0], [0], [1], [0, 0, 1, 1], [], []>} : vector<8x8xbf16>, vector<8x128xbf16>, vector<8x128xf32> -> vector<8x128xf32>
    %14 = arith.addf %9, %13 : vector<8x128xf32>
    %15 = arith.truncf %14 : vector<8x128xf32> to vector<8x128xbf16>
    %c0_13 = arith.constant 0 : index
    %c0_14 = arith.constant 0 : index
    %16 = vector.load %arg6[%c0_13, %c0_14] : memref<128x128xbf16, #tpu.memory_space<vmem>>, vector<128x128xbf16>
    %cst_15 = arith.constant dense<0.000000e+00> : vector<8x128xf32>
    %17 = tpu.matmul %15, %16, %cst_15 {dimension_numbers = #tpu.dot_dimension_numbers<[1], [0], [0], [1], [0, 0, 1, 1], [], []>} : vector<8x128xbf16>, vector<128x128xbf16>, vector<8x128xf32> -> vector<8x128xf32>
    %c0_16 = arith.constant 0 : index
    %c0_17 = arith.constant 0 : index
    %18 = vector.load %arg7[%c0_16, %c0_17] : memref<1x128xf32, #tpu.memory_space<vmem>>, vector<1x128xf32>
    %19 = vector.broadcast %18 : vector<1x128xf32> to vector<8x128xf32>
    %20 = arith.addf %17, %19 : vector<8x128xf32>
    %c0_18 = arith.constant 0 : index
    %c0_19 = arith.constant 0 : index
    %21 = vector.load %arg8[%c0_18, %c0_19] : memref<8x128xf32, #tpu.memory_space<vmem>>, vector<8x128xf32>
    tpu.vector_store %arg8[%c0_18, %c0_19], %20 {strides = array<i32>} : memref<8x128xf32, #tpu.memory_space<vmem>>, vector<8x128xf32>,
    return
  }
  func.func @transform_0(%arg0: i32) -> (i32, i32, i32) {
    %c0_i32 = arith.constant 0 : i32
    %c0_i32_0 = arith.constant 0 : i32
    %c0_i32_1 = arith.constant 0 : i32
    return %arg0, %c0_i32, %c0_i32_0 : i32, i32, i32
  }
  func.func @transform_1(%arg0: i32) -> (i32, i32) {
    %c0_i32 = arith.constant 0 : i32
    %c0_i32_0 = arith.constant 0 : i32
    return %arg0, %c0_i32 : i32, i32
  }
  func.func @transform_2(%arg0: i32) -> (i32, i32) {
    %c0_i32 = arith.constant 0 : i32
    %c0_i32_0 = arith.constant 0 : i32
    %c0_i32_1 = arith.constant 0 : i32
    return %c0_i32, %c0_i32_0 : i32, i32
  }
  func.func @transform_3(%arg0: i32) -> (i32, i32) {
    %c0_i32 = arith.constant 0 : i32
    %c0_i32_0 = arith.constant 0 : i32
    %c0_i32_1 = arith.constant 0 : i32
    return %c0_i32, %c0_i32_0 : i32, i32
  }
  func.func @transform_4(%arg0: i32) -> (i32, i32) {
    %c0_i32 = arith.constant 0 : i32
    %c0_i32_0 = arith.constant 0 : i32
    %c0_i32_1 = arith.constant 0 : i32
    return %c0_i32, %c0_i32_0 : i32, i32
  }
  func.func @transform_5(%arg0: i32) -> (i32, i32) {
    %c0_i32 = arith.constant 0 : i32
    %c0_i32_0 = arith.constant 0 : i32
    %c0_i32_1 = arith.constant 0 : i32
    return %c0_i32, %c0_i32_0 : i32, i32
  }
  func.func @transform_6(%arg0: i32) -> (i32, i32) {
    %c0_i32 = arith.constant 0 : i32
    %c0_i32_0 = arith.constant 0 : i32
    %c0_i32_1 = arith.constant 0 : i32
    return %c0_i32, %c0_i32_0 : i32, i32
  }
  func.func @transform_7(%arg0: i32) -> (i32, i32) {
    %c0_i32 = arith.constant 0 : i32
    %c0_i32_0 = arith.constant 0 : i32
    return %arg0, %c0_i32 : i32, i32
  }
}

module attributes {stable_mosaic.version = 11 : i64} {
  func.func @_clip_loss_kernel(%arg0: i32, %arg1: memref<1x1xf32, #tpu.memory_space<smem>>, %arg2: memref<16x128xf32, #tpu.memory_space<vmem>>, %arg3: memref<16x128xf32, #tpu.memory_space<vmem>>, %arg4: memref<1x1xf32, #tpu.memory_space<vmem>>) attributes {dimension_semantics = [#tpu.dimension_semantics<arbitrary>], iteration_bounds = array<i64: 1>, scalar_prefetch = 0 : i64, scratch_operands = 0 : i64, tpu.core_type = #tpu.core_type<tc>, window_params = [{transform_indices = @transform_0, window_bounds = array<i64: 1, 1>}, {pipeline_mode = #tpu.pipeline_mode<synchronous>, transform_indices = @transform_1, window_bounds = array<i64: 16, 128>}, {pipeline_mode = #tpu.pipeline_mode<synchronous>, transform_indices = @transform_2, window_bounds = array<i64: 16, 128>}, {pipeline_mode = #tpu.pipeline_mode<synchronous>, transform_indices = @transform_3, window_bounds = array<i64: 1, 1>}]} {
    %c0 = arith.constant 0 : index
    %c0_0 = arith.constant 0 : index
    %0 = memref.load %arg1[%c0, %c0_0] : memref<1x1xf32, #tpu.memory_space<smem>>
    %c0_1 = arith.constant 0 : index
    %c0_2 = arith.constant 0 : index
    %1 = vector.load %arg2[%c0_1, %c0_2] : memref<16x128xf32, #tpu.memory_space<vmem>>, vector<16x128xf32>
    %c0_3 = arith.constant 0 : index
    %c0_4 = arith.constant 0 : index
    %2 = vector.load %arg3[%c0_3, %c0_4] : memref<16x128xf32, #tpu.memory_space<vmem>>, vector<16x128xf32>
    %3 = arith.mulf %1, %1 : vector<16x128xf32>
    %cst = arith.constant dense<0.000000e+00> : vector<16xf32>
    %4 = vector.multi_reduction <add>, %3, %cst [1] : vector<16x128xf32> to vector<16xf32>
    %5 = vector.shape_cast %4 : vector<16xf32> to vector<16x1xf32>
    %cst_5 = arith.constant 9.99999996E-13 : f32
    %6 = vector.broadcast %cst_5 : f32 to vector<16x1xf32>
    %7 = arith.addf %5, %6 : vector<16x1xf32>
    %8 = math.rsqrt %7 : vector<16x1xf32>
    %9 = vector.broadcast %8 : vector<16x1xf32> to vector<16x128xf32>
    %10 = arith.mulf %1, %9 : vector<16x128xf32>
    %11 = arith.mulf %2, %2 : vector<16x128xf32>
    %cst_6 = arith.constant dense<0.000000e+00> : vector<16xf32>
    %12 = vector.multi_reduction <add>, %11, %cst_6 [1] : vector<16x128xf32> to vector<16xf32>
    %13 = vector.shape_cast %12 : vector<16xf32> to vector<16x1xf32>
    %cst_7 = arith.constant 9.99999996E-13 : f32
    %14 = vector.broadcast %cst_7 : f32 to vector<16x1xf32>
    %15 = arith.addf %13, %14 : vector<16x1xf32>
    %16 = math.rsqrt %15 : vector<16x1xf32>
    %17 = vector.broadcast %16 : vector<16x1xf32> to vector<16x128xf32>
    %18 = arith.mulf %2, %17 : vector<16x128xf32>
    %cst_8 = arith.constant dense<0.000000e+00> : vector<16x16xf32>
    %19 = tpu.matmul %10, %18, %cst_8 {dimension_numbers = #tpu.dot_dimension_numbers<[1], [1], [0], [0], [0, 0, 1, 0], [], []>} : vector<16x128xf32>, vector<16x128xf32>, vector<16x16xf32> -> vector<16x16xf32>
    %20 = vector.broadcast %0 : f32 to vector<16x16xf32>
    %21 = arith.mulf %19, %20 : vector<16x16xf32>
    %22 = arith.mulf %10, %18 : vector<16x128xf32>
    %cst_9 = arith.constant dense<0.000000e+00> : vector<16xf32>
    %23 = vector.multi_reduction <add>, %22, %cst_9 [1] : vector<16x128xf32> to vector<16xf32>
    %24 = vector.shape_cast %23 : vector<16xf32> to vector<16x1xf32>
    %25 = vector.broadcast %0 : f32 to vector<16x1xf32>
    %26 = arith.mulf %24, %25 : vector<16x1xf32>
    %cst_10 = arith.constant dense<0xFF800000> : vector<16xf32>
    %27 = vector.multi_reduction <maximumf>, %21, %cst_10 [1] : vector<16x16xf32> to vector<16xf32>
    %28 = vector.shape_cast %27 : vector<16xf32> to vector<16x1xf32>
    %29 = vector.broadcast %28 : vector<16x1xf32> to vector<16x16xf32>
    %30 = arith.subf %21, %29 : vector<16x16xf32>
    %31 = math.exp %30 : vector<16x16xf32>
    %cst_11 = arith.constant dense<0.000000e+00> : vector<16xf32>
    %32 = vector.multi_reduction <add>, %31, %cst_11 [1] : vector<16x16xf32> to vector<16xf32>
    %33 = vector.shape_cast %32 : vector<16xf32> to vector<16x1xf32>
    %34 = math.log %33 : vector<16x1xf32>
    %35 = arith.addf %28, %34 : vector<16x1xf32>
    %cst_12 = arith.constant dense<0xFF800000> : vector<16xf32>
    %36 = vector.multi_reduction <maximumf>, %21, %cst_12 [0] : vector<16x16xf32> to vector<16xf32>
    %37 = vector.shape_cast %36 : vector<16xf32> to vector<1x16xf32>
    %38 = vector.broadcast %37 : vector<1x16xf32> to vector<16x16xf32>
    %39 = arith.subf %21, %38 : vector<16x16xf32>
    %40 = math.exp %39 : vector<16x16xf32>
    %cst_13 = arith.constant dense<0.000000e+00> : vector<16xf32>
    %41 = vector.multi_reduction <add>, %40, %cst_13 [0] : vector<16x16xf32> to vector<16xf32>
    %42 = vector.shape_cast %41 : vector<16xf32> to vector<1x16xf32>
    %43 = math.log %42 : vector<1x16xf32>
    %44 = arith.addf %37, %43 : vector<1x16xf32>
    %45 = vector.shape_cast %35 : vector<16x1xf32> to vector<1x16x1xf32>
    %cst_14 = arith.constant dense<0.000000e+00> : vector<1xf32>
    %46 = vector.multi_reduction <add>, %45, %cst_14 [1, 2] : vector<1x16x1xf32> to vector<1xf32>
    %47 = vector.shape_cast %46 : vector<1xf32> to vector<1x1x1xf32>
    %48 = vector.extract %47[0, 0, 0] : f32 from vector<1x1x1xf32>
    %49 = vector.shape_cast %26 : vector<16x1xf32> to vector<1x16x1xf32>
    %cst_15 = arith.constant dense<0.000000e+00> : vector<1xf32>
    %50 = vector.multi_reduction <add>, %49, %cst_15 [1, 2] : vector<1x16x1xf32> to vector<1xf32>
    %51 = vector.shape_cast %50 : vector<1xf32> to vector<1x1x1xf32>
    %52 = vector.extract %51[0, 0, 0] : f32 from vector<1x1x1xf32>
    %53 = arith.subf %48, %52 : f32
    %cst_16 = arith.constant 1.600000e+01 : f32
    %54 = arith.divf %53, %cst_16 : f32
    %55 = vector.shape_cast %44 : vector<1x16xf32> to vector<1x1x16xf32>
    %cst_17 = arith.constant dense<0.000000e+00> : vector<1xf32>
    %56 = vector.multi_reduction <add>, %55, %cst_17 [1, 2] : vector<1x1x16xf32> to vector<1xf32>
    %57 = vector.shape_cast %56 : vector<1xf32> to vector<1x1x1xf32>
    %58 = vector.extract %57[0, 0, 0] : f32 from vector<1x1x1xf32>
    %59 = vector.shape_cast %26 : vector<16x1xf32> to vector<1x16x1xf32>
    %cst_18 = arith.constant dense<0.000000e+00> : vector<1xf32>
    %60 = vector.multi_reduction <add>, %59, %cst_18 [1, 2] : vector<1x16x1xf32> to vector<1xf32>
    %61 = vector.shape_cast %60 : vector<1xf32> to vector<1x1x1xf32>
    %62 = vector.extract %61[0, 0, 0] : f32 from vector<1x1x1xf32>
    %63 = arith.subf %58, %62 : f32
    %cst_19 = arith.constant 1.600000e+01 : f32
    %64 = arith.divf %63, %cst_19 : f32
    %65 = arith.addf %54, %64 : f32
    %cst_20 = arith.constant 5.000000e-01 : f32
    %66 = arith.mulf %cst_20, %65 : f32
    %67 = vector.broadcast %66 : f32 to vector<1x1xf32>
    %c0_21 = arith.constant 0 : index
    %c0_22 = arith.constant 0 : index
    %68 = vector.load %arg4[%c0_21, %c0_22] : memref<1x1xf32, #tpu.memory_space<vmem>>, vector<1x1xf32>
    tpu.vector_store %arg4[%c0_21, %c0_22], %67 {strides = array<i32>} : memref<1x1xf32, #tpu.memory_space<vmem>>, vector<1x1xf32>,
    return
  }
  func.func @transform_0(%arg0: i32) -> (i32, i32) {
    %c0_i32 = arith.constant 0 : i32
    %c0_i32_0 = arith.constant 0 : i32
    %c0_i32_1 = arith.constant 0 : i32
    return %c0_i32, %c0_i32_0 : i32, i32
  }
  func.func @transform_1(%arg0: i32) -> (i32, i32) {
    %c0_i32 = arith.constant 0 : i32
    %c0_i32_0 = arith.constant 0 : i32
    %c0_i32_1 = arith.constant 0 : i32
    return %c0_i32, %c0_i32_0 : i32, i32
  }
  func.func @transform_2(%arg0: i32) -> (i32, i32) {
    %c0_i32 = arith.constant 0 : i32
    %c0_i32_0 = arith.constant 0 : i32
    %c0_i32_1 = arith.constant 0 : i32
    return %c0_i32, %c0_i32_0 : i32, i32
  }
  func.func @transform_3(%arg0: i32) -> (i32, i32) {
    %c0_i32 = arith.constant 0 : i32
    %c0_i32_0 = arith.constant 0 : i32
    %c0_i32_1 = arith.constant 0 : i32
    return %c0_i32, %c0_i32_0 : i32, i32
  }
}

</mosaic_0001>

<bundles_post_ra>
// kernel: eccl_single_forward.4
= control target key start
LH: loop header
LB: loop body
LE: loop exit
PB: predicated region body
PF: predicated region fallthrough
CT: control target
= control target key end

     0   :  { %s790_s18 = smov 0   ;;  %s978_s0 = inlined_call_operand.vmem [shape: f32[16,64,16], index: 0, kind: input, shape index: {}]   ;;  %s979_s1 = inlined_call_operand.vmem [shape: bf16[16,128], index: 1, kind: input, shape index: {}]   ;;  %s980_s2 = inlined_call_operand.vmem [shape: f32[1,128], index: 2, kind: input, shape index: {}]   ;;  %s981_s3 = inlined_call_operand.vmem [shape: bf16[128,128], index: 3, kind: input, shape index: {}]   ;;  %s982_s4 = inlined_call_operand.vmem [shape: f32[1,128], index: 4, kind: input, shape index: {}]   ;;  %s983_s5 = inlined_call_operand.vmem [shape: f32[16,128], index: 5, kind: output, shape index: {}]  }
   0x1 LB: > { %s796_s19 = sadd.s32 4294967295, %s757_s18   ;;  %p684_p0 = scmp.ge.s32.totalorder %s757_s18, 1  ;;  %s757_s18 = sphi %s790_s18, %s15_s18  }
   0x2   : > { %p189_p1 = scmp.lt.s32.totalorder %s757_s18, 3 }
   0x4   : > { %p190_p2 = pnand %p684_p0, %p189_p1 }
   0x5   : > { %s685_s22 = sshll.u32 (!%p190_p2), %s796_s19, 3  ;;  %p224_p4 = scmp.lt.s32.totalorder (!%p190_p2), %s796_s19, 1 }
   0x6   : > { %193 = sbr.rel (%p190_p2) target bundleno = 341 (0x155), region = 40  ;;  %p218_p3 = scmp.lt.s32.totalorder (!%p190_p2), %s685_s22, 15 }
   0xb   : > { %v729_v0 = vld [vmem:[%s979_s1] sm:$0xff]  ;;  %s985_s22 = smov (!%p218_p3, %s685_s22), 15  ;;  %vm293_vm0 = vcmask 130048   ;;  %vm507_vm2 = vcmask 1041409   ;;  %vm509_vm3 = vcmask 1042434   ;;  %vm511_vm4 = vcmask 1043459  }
   0xc   : > { %538 = vmatpush.bf16.msra.mxu0 %v729_v0  ;;  %s728_s23 = sshll.u32 %s985_s22, 6  ;;  %vm513_vm5 = vcmask 1044484   ;;  %vm515_vm6 = vcmask 1045509   ;;  %vm517_vm7 = vcmask 1046534   ;;  %vm519_vm8 = vcmask 1047559   ;;  %s987_s19 = smov (!%p224_p4, %s796_s19), 1 }
   0xd   : > { %s807_s26 = scalar_lea.vmem %s978_s0, %s728_s23  ;;  %s688_s22 = sshll.u32 %s987_s19, 3 }
   0xe   : > { %v229_v1 = vld [vmem:[%s807_s26] sm:$0xff]  ;;  %v230_v2 = vld [vmem:[%s807_s26 + $0x8] sm:$0xff]  ;;  %v231_v3 = vld [vmem:[%s807_s26 + $0x10] sm:$0xff]  ;;  %s227_s27 = scalar_lea.vmem %s983_s5, %s688_s22 }
   0xf   : > { %v232_v4 = vld [vmem:[%s807_s26 + $0x18] sm:$0xff]  ;;  %v294_v5 = vsel %vm293_vm0, %v229_v1, 0.0  ;;  %v295_v6 = vsel %vm293_vm0, %v230_v2, 0.0  ;;  %v297_v7 = vsel %vm293_vm0, %v231_v3, 0.0  ;;  %v237_v8 = vld [vmem:[%s807_s26 + $0x40] sm:$0xff]  ;;  %v238_v10 = vld [vmem:[%s807_s26 + $0x48] sm:$0xff] }
  0x10   : > { %v296_v9 = vadd.f32 %v295_v6, %v294_v5  ;;  %v239_v11 = vld [vmem:[%s807_s26 + $0x50] sm:$0xff]  ;;  %v240_v12 = vld [vmem:[%s807_s26 + $0x58] sm:$0xff]  ;;  %v299_v13 = vsel %vm293_vm0, %v232_v4, 0.0  ;;  %v315_v14 = vsel %vm293_vm0, %v237_v8, 0.0  ;;  %v233_v15 = vld [vmem:[%s807_s26 + $0x20] sm:$0xff]  ;;  %v316_v17 = vsel %vm293_vm0, %v238_v10, 0.0 }
  0x11   : > { %v318_v18 = vsel %vm293_vm0, %v239_v11, 0.0  ;;  %v245_v19 = vld [vmem:[%s807_s26 + $0x80] sm:$0xff]  ;;  %v246_v20 = vld [vmem:[%s807_s26 + $0x88] sm:$0xff]  ;;  %v317_v21 = vadd.f32 %v316_v17, %v315_v14  ;;  %v247_v23 = vld [vmem:[%s807_s26 + $0x90] sm:$0xff]  ;;  %v320_v26 = vsel %vm293_vm0, %v240_v12, 0.0  ;;  %v301_v31 = vsel %vm293_vm0, %v233_v15, 0.0 }
  0x12   : > { %v298_v16 = vadd.f32 %v297_v7, %v296_v9  ;;  %v241_v22 = vld [vmem:[%s807_s26 + $0x60] sm:$0xff]  ;;  %v248_v24 = vld [vmem:[%s807_s26 + $0x98] sm:$0xff]  ;;  %v336_v27 = vsel %vm293_vm0, %v245_v19, 0.0  ;;  %v337_v28 = vsel %vm293_vm0, %v246_v20, 0.0  ;;  %v234_v29 = vld [vmem:[%s807_s26 + $0x28] sm:$0xff]  ;;  %v339_v34 = vsel %vm293_vm0, %v247_v23, 0.0 }
  0x13   : > { %v249_v30 = vld [vmem:[%s807_s26 + $0xa0] sm:$0xff]  ;;  %v319_v32 = vadd.f32 %v318_v18, %v317_v21  ;;  %v338_v33 = vadd.f32 %v337_v28, %v336_v27  ;;  %v254_v36 = vld [vmem:[%s807_s26 + $0xc8] sm:$0xff]  ;;  %v255_v37 = vld [vmem:[%s807_s26 + $0xd0] sm:$0xff]  ;;  %v341_v38 = vsel %vm293_vm0, %v248_v24, 0.0  ;;  %v322_v42 = vsel %vm293_vm0, %v241_v22, 0.0 }
  0x14   : > { %v300_v25 = vadd.f32 %v299_v13, %v298_v16  ;;  %v253_v35 = vld [vmem:[%s807_s26 + $0xc0] sm:$0xff]  ;;  %v242_v39 = vld [vmem:[%s807_s26 + $0x68] sm:$0xff]  ;;  %v256_v40 = vld [vmem:[%s807_s26 + $0xd8] sm:$0xff]  ;;  %v343_v48 = vsel %vm293_vm0, %v249_v30, 0.0  ;;  %v358_v49 = vsel %vm293_vm0, %v254_v36, 0.0  ;;  %v360_v50 = vsel %vm293_vm0, %v255_v37, 0.0 }
  0x15   : > { %v321_v41 = vadd.f32 %v320_v26, %v319_v32  ;;  %v340_v43 = vadd.f32 %v339_v34, %v338_v33  ;;  %v357_v44 = vsel %vm293_vm0, %v253_v35, 0.0  ;;  %v250_v45 = vld [vmem:[%s807_s26 + $0xa8] sm:$0xff]  ;;  %v261_v46 = vld [vmem:[%s807_s26 + $0x100] sm:$0xff]  ;;  %v263_v53 = vld [vmem:[%s807_s26 + $0x110] sm:$0xff]  ;;  %v303_v54 = vsel %vm293_vm0, %v234_v29, 0.0 }
  0x16   : > { %v302_v47 = vadd.f32 %v301_v31, %v300_v25  ;;  %v257_v51 = vld [vmem:[%s807_s26 + $0xe0] sm:$0xff]  ;;  %v262_v52 = vld [vmem:[%s807_s26 + $0x108] sm:$0xff]  ;;  %v359_v56 = vadd.f32 %v358_v49, %v357_v44  ;;  %v235_v57 = vld [vmem:[%s807_s26 + $0x30] sm:$0xff]  ;;  %v324_v59 = vsel %vm293_vm0, %v242_v39, 0.0  ;;  %v362_v60 = vsel %vm293_vm0, %v256_v40, 0.0 }
  0x17   : > { %v342_v55 = vadd.f32 %v341_v38, %v340_v43  ;;  %v323_v58 = vadd.f32 %v322_v42, %v321_v41  ;;  %v258_v61 = vld [vmem:[%s807_s26 + $0xe8] sm:$0xff]  ;;  %v264_v62 = vld [vmem:[%s807_s26 + $0x118] sm:$0xff]  ;;  %v345_v0 = vsel %vm293_vm0, %v250_v45, 0.0  ;;  %v378_v2 = vsel %vm293_vm0, %v261_v46, 0.0  ;;  %v243_v3 = vld [vmem:[%s807_s26 + $0x70] sm:$0xff] }
  0x18   : > { %v361_v1 = vadd.f32 %v360_v50, %v359_v56  ;;  %v304_v4 = vadd.f32 %v303_v54, %v302_v47  ;;  %v364_v5 = vsel %vm293_vm0, %v257_v51, 0.0  ;;  %v379_v6 = vsel %vm293_vm0, %v262_v52, 0.0  ;;  %v251_v8 = vld [vmem:[%s807_s26 + $0xb0] sm:$0xff]  ;;  %v265_v9 = vld [vmem:[%s807_s26 + $0x120] sm:$0xff]  ;;  %v236_v13 = vld [vmem:[%s807_s26 + $0x38] sm:$0xff] }
  0x19   : > { %v344_v63 = vadd.f32 %v343_v48, %v342_v55  ;;  %v381_v7 = vsel %vm293_vm0, %v263_v53, 0.0  ;;  %v305_v10 = vsel %vm293_vm0, %v235_v57, 0.0  ;;  %v380_v12 = vadd.f32 %v379_v6, %v378_v2  ;;  %v269_v14 = vld [vmem:[%s807_s26 + $0x140] sm:$0xff]  ;;  %v259_v18 = vld [vmem:[%s807_s26 + $0xf0] sm:$0xff]  ;;  %v266_v19 = vld [vmem:[%s807_s26 + $0x128] sm:$0xff] }
  0x1a   : > { %v363_v11 = vadd.f32 %v362_v60, %v361_v1  ;;  %v325_v15 = vadd.f32 %v324_v59, %v323_v58  ;;  %v366_v16 = vsel %vm293_vm0, %v258_v61, 0.0  ;;  %v383_v17 = vsel %vm293_vm0, %v264_v62, 0.0  ;;  %v270_v20 = vld [vmem:[%s807_s26 + $0x148] sm:$0xff]  ;;  %v244_v25 = vld [vmem:[%s807_s26 + $0x78] sm:$0xff]  ;;  %v271_v26 = vld [vmem:[%s807_s26 + $0x150] sm:$0xff] }
  0x1b   : > { %v326_v21 = vsel %vm293_vm0, %v243_v3, 0.0  ;;  %v346_v22 = vadd.f32 %v345_v0, %v344_v63  ;;  %v382_v24 = vadd.f32 %v381_v7, %v380_v12  ;;  %v306_v27 = vadd.f32 %v305_v10, %v304_v4  ;;  %v252_v30 = vld [vmem:[%s807_s26 + $0xb8] sm:$0xff]  ;;  %v267_v31 = vld [vmem:[%s807_s26 + $0x130] sm:$0xff]  ;;  %v273_v47 = vld [vmem:[%s807_s26 + $0x160] sm:$0xff] }
  0x1c   : > { %v365_v23 = vadd.f32 %v364_v5, %v363_v11  ;;  %v347_v28 = vsel %vm293_vm0, %v251_v8, 0.0  ;;  %v385_v29 = vsel %vm293_vm0, %v265_v9, 0.0  ;;  %v307_v32 = vsel %vm293_vm0, %v236_v13, 0.0  ;;  %v272_v36 = vld [vmem:[%s807_s26 + $0x158] sm:$0xff]  ;;  %v274_v55 = vld [vmem:[%s807_s26 + $0x168] sm:$0xff]  ;;  %v277_v56 = vld [vmem:[%s807_s26 + $0x180] sm:$0xff] }
  0x1d   : > { %v384_v34 = vadd.f32 %v383_v17, %v382_v24  ;;  %v399_v35 = vsel %vm293_vm0, %v269_v14, 0.0  ;;  %v327_v37 = vadd.f32 %v326_v21, %v325_v15  ;;  %v368_v38 = vsel %vm293_vm0, %v259_v18, 0.0  ;;  %v260_v41 = vld [vmem:[%s807_s26 + $0xf8] sm:$0xff]  ;;  %v278_v61 = vld [vmem:[%s807_s26 + $0x188] sm:$0xff]  ;;  %v275_v1 = vld [vmem:[%s807_s26 + $0x170] sm:$0xff] }
  0x1e   : > { %v367_v33 = vadd.f32 %v366_v16, %v365_v23  ;;  %v387_v39 = vsel %vm293_vm0, %v266_v19, 0.0  ;;  %v400_v40 = vsel %vm293_vm0, %v270_v20, 0.0  ;;  %v268_v42 = vld [vmem:[%s807_s26 + $0x138] sm:$0xff]  ;;  %v328_v43 = vsel %vm293_vm0, %v244_v25, 0.0  ;;  %v279_v2 = vld [vmem:[%s807_s26 + $0x190] sm:$0xff]  ;;  %v285_v14 = vld [vmem:[%s807_s26 + $0x1c0] sm:$0xff] }
  0x1f   : > { %v348_v44 = vadd.f32 %v347_v28, %v346_v22  ;;  %v386_v45 = vadd.f32 %v385_v29, %v384_v34  ;;  %v402_v46 = vsel %vm293_vm0, %v271_v26, 0.0  ;;  %v308_v48 = vadd.f32 %v307_v32, %v306_v27  ;;  %v276_v9 = vld [vmem:[%s807_s26 + $0x178] sm:$0xff]  ;;  %v281_v18 = vld [vmem:[%s807_s26 + $0x1a0] sm:$0xff]  ;;  %v286_v19 = vld [vmem:[%s807_s26 + $0x1c8] sm:$0xff] }
  0x20   : > { %v349_v49 = vsel %vm293_vm0, %v252_v30, 0.0  ;;  %v389_v50 = vsel %vm293_vm0, %v267_v31, 0.0  ;;  %v401_v51 = vadd.f32 %v400_v40, %v399_v35  ;;  %v369_v52 = vadd.f32 %v368_v38, %v367_v33  ;;  %v280_v10 = vld [vmem:[%s807_s26 + $0x198] sm:$0xff]  ;;  %v287_v20 = vld [vmem:[%s807_s26 + $0x1d0] sm:$0xff]  ;;  %v282_v28 = vld [vmem:[%s807_s26 + $0x1a8] sm:$0xff] }
  0x21   : > { %v388_v53 = vadd.f32 %v387_v39, %v386_v45  ;;  %v404_v54 = vsel %vm293_vm0, %v272_v36, 0.0  ;;  %v329_v57 = vadd.f32 %v328_v43, %v327_v37  ;;  %v370_v58 = vsel %vm293_vm0, %v260_v41, 0.0  ;;  %v288_v29 = vld [vmem:[%s807_s26 + $0x1d8] sm:$0xff]  ;;  %v283_v38 = vld [vmem:[%s807_s26 + $0x1b0] sm:$0xff]  ;;  %v289_v39 = vld [vmem:[%s807_s26 + $0x1e0] sm:$0xff] }
  0x22   : > { %v391_v59 = vsel %vm293_vm0, %v268_v42, 0.0  ;;  %v403_v60 = vadd.f32 %v402_v46, %v401_v51  ;;  %v350_v62 = vadd.f32 %v349_v49, %v348_v44  ;;  %v406_v0 = vsel %vm293_vm0, %v273_v47, 0.0  ;;  %v290_v49 = vld [vmem:[%s807_s26 + $0x1e8] sm:$0xff] }
  0x23   : > { %v390_v63 = vadd.f32 %v389_v50, %v388_v53  ;;  %v309_v3 = vrot.slane %v308_v48, 4  ;;  %v371_v5 = vadd.f32 %v370_v58, %v369_v52  ;;  %v408_v7 = vsel %vm293_vm0, %v274_v55, 0.0  ;;  %v291_v58 = vld [vmem:[%s807_s26 + $0x1f0] sm:$0xff] }
  0x24   : > { %v405_v4 = vadd.f32 %v404_v54, %v403_v60  ;;  %v420_v8 = vsel %vm293_vm0, %v277_v56, 0.0  ;;  %v330_v11 = vrot.slane %v329_v57, 4  ;;  %v421_v13 = vsel %vm293_vm0, %v278_v61, 0.0 }
  0x25   : > { %v392_v6 = vadd.f32 %v391_v59, %v390_v63  ;;  %v351_v15 = vrot.slane %v350_v62, 4  ;;  %v410_v16 = vsel %vm293_vm0, %v275_v1, 0.0  ;;  %v423_v17 = vsel %vm293_vm0, %v279_v2, 0.0 }
  0x26   : > { %v407_v12 = vadd.f32 %v406_v0, %v405_v4  ;;  %v310_v21 = vadd.f32 %v309_v3, %v308_v48  ;;  %v422_v23 = vadd.f32 %v421_v13, %v420_v8  ;;  %v372_v24 = vrot.slane %v371_v5, 4  ;;  %v284_v48 = vld [vmem:[%s807_s26 + $0x1b8] sm:$0xff]  ;;  %v736_v3 = vld [vmem:[%s981_s3 + $0x30] sm:$0xff] }
  0x27   : > { %v393_v25 = vrot.slane %v392_v6, 4  ;;  %v412_v26 = vsel %vm293_vm0, %v276_v9, 0.0  ;;  %v425_v27 = vsel %vm293_vm0, %v280_v10, 0.0  ;;  %v331_v30 = vadd.f32 %v330_v11, %v329_v57  ;;  %v737_v57 = vld [vmem:[%s981_s3 + $0x38] sm:$0xff] }
  0x28   : > { %v409_v22 = vadd.f32 %v408_v7, %v407_v12  ;;  %v424_v32 = vadd.f32 %v423_v17, %v422_v23  ;;  %v441_v33 = vsel %vm293_vm0, %v285_v14, 0.0  ;;  %v352_v34 = vadd.f32 %v351_v15, %v350_v62  ;;  %613 = vmatpush.bf16.msra.mxu1 %v737_v57  ;;  %v292_v4 = vld [vmem:[%s807_s26 + $0x1f8] sm:$0xff]  ;;  %v732_v57 = vld [vmem:[%s981_s3 + $0x10] sm:$0xff] }
  0x29   : > { %v427_v35 = vsel %vm293_vm0, %v281_v18, 0.0  ;;  %v442_v36 = vsel %vm293_vm0, %v286_v19, 0.0  ;;  %v444_v37 = vsel %vm293_vm0, %v287_v20, 0.0  ;;  %v311_v40 = vrot.slane %v310_v21, 2  ;;  %v735_v18 = vld [vmem:[%s981_s3 + $0x28] sm:$0xff] }
  0x2a   : > { %v411_v31 = vadd.f32 %v410_v16, %v409_v22  ;;  %v426_v42 = vadd.f32 %v425_v27, %v424_v32  ;;  %v443_v43 = vadd.f32 %v442_v36, %v441_v33  ;;  %v373_v44 = vadd.f32 %v372_v24, %v371_v5  ;;  %v734_v32 = vld [vmem:[%s981_s3 + $0x20] sm:$0xff] }
  0x2b   : > { %v394_v45 = vadd.f32 %v393_v25, %v392_v6  ;;  %v429_v46 = vsel %vm293_vm0, %v282_v28, 0.0  ;;  %v446_v47 = vsel %vm293_vm0, %v288_v29, 0.0  ;;  %v332_v50 = vrot.slane %v331_v30, 2 }
  0x2c   : > { %v413_v41 = vadd.f32 %v412_v26, %v411_v31  ;;  %v428_v52 = vadd.f32 %v427_v35, %v426_v42  ;;  %v445_v53 = vadd.f32 %v444_v37, %v443_v43  ;;  %v353_v54 = vrot.slane %v352_v34, 2  ;;  %614 = vmatpush.bf16.msra.mxu1 %v736_v3 }
  0x2d   : > { %v431_v55 = vsel %vm293_vm0, %v283_v38, 0.0  ;;  %v448_v56 = vsel %vm293_vm0, %v289_v39, 0.0  ;;  %v759_v62 = vmov 64.0   ;;  %v374_v63 = vrot.slane %v373_v44, 2 }
  0x2e   : > { %v414_v51 = vrot.slane %v413_v41, 4  ;;  %v430_v60 = vadd.f32 %v429_v46, %v428_v52  ;;  %v447_v61 = vadd.f32 %v446_v47, %v445_v53  ;;  %749 = vrcp.f32 %v759_v62 }
  0x2f   : > { %v395_v0 = vrot.slane %v394_v45, 2  ;;  %v433_v1 = vsel %vm293_vm0, %v284_v48, 0.0  ;;  %v450_v2 = vsel %vm293_vm0, %v290_v49, 0.0  ;;  %v312_v8 = vadd.f32 %v311_v40, %v310_v21 }
  0x30   : > { %v415_v59 = vadd.f32 %v414_v51, %v413_v41  ;;  %v432_v6 = vadd.f32 %v431_v55, %v430_v60  ;;  %v449_v7 = vadd.f32 %v448_v56, %v447_v61  ;;  %v333_v9 = vadd.f32 %v332_v50, %v331_v30  ;;  %615 = vmatpush.bf16.msra.mxu1 %v735_v18 }
  0x31   : > { %v452_v10 = vsel %vm293_vm0, %v291_v58, 0.0  ;;  %v354_v11 = vadd.f32 %v353_v54, %v352_v34  ;;  %v375_v14 = vadd.f32 %v374_v63, %v373_v44  ;;  %v396_v15 = vadd.f32 %v395_v0, %v394_v45  ;;  %v733_v45 = vld [vmem:[%s981_s3 + $0x18] sm:$0xff] }
  0x32   : > { %v416_v5 = vrot.slane %v415_v59, 2  ;;  %v434_v12 = vadd.f32 %v433_v1, %v432_v6  ;;  %v451_v13 = vadd.f32 %v450_v2, %v449_v7  ;;  %v454_v17 = vsel %vm293_vm0, %v292_v4, 0.0 }
  0x33   : > { %v313_v21 = vrot.slane %v312_v8, 1  ;;  %v334_v23 = vrot.slane %v333_v9, 1  ;;  %v355_v25 = vrot.slane %v354_v11, 1  ;;  %v376_v28 = vrot.slane %v375_v14, 1 }
  0x34   : > { %v417_v16 = vadd.f32 %v416_v5, %v415_v59  ;;  %v750_v19 = vpop.eup %749  ;;  %v435_v20 = vrot.slane %v434_v12, 4  ;;  %v453_v22 = vadd.f32 %v452_v10, %v451_v13  ;;  %v397_v29 = vrot.slane %v396_v15, 1  ;;  %616 = vmatpush.bf16.msra.mxu1 %v734_v32 }
  0x35   : > { %v463_v24 = vmul.f32 64.0, %v750_v19  ;;  %v314_v35 = vadd.f32 %v313_v21, %v312_v8  ;;  %v335_v36 = vadd.f32 %v334_v23, %v333_v9  ;;  %v356_v38 = vadd.f32 %v355_v25, %v354_v11  ;;  %v731_v9 = vld [vmem:[%s981_s3 + $0x8] sm:$0xff]  ;;  %v730_v23 = vld [vmem:[%s981_s3] sm:$0xff] }
  0x36   : > { %v436_v26 = vadd.f32 %v435_v20, %v434_v12  ;;  %v455_v27 = vadd.f32 %v454_v17, %v453_v22  ;;  %v418_v30 = vrot.slane %v417_v16, 1  ;;  %vm467_vm1 = vweird.f32 %v750_v19 }
  0x37   : > { %v464_v31 = vsub.f32 1.0, %v463_v24  ;;  %v377_v41 = vadd.f32 %v376_v28, %v375_v14  ;;  %v398_v42 = vadd.f32 %v397_v29, %v396_v15  ;;  %v747_v24 = vld [vmem:[%s980_s2] ss:$0 sm:$0xff] }
  0x38   : > { %v437_v33 = vrot.slane %v436_v26, 2  ;;  %v456_v34 = vrot.slane %v455_v27, 4  ;;  %v419_v43 = vadd.f32 %v418_v30, %v417_v16  ;;  %617 = vmatpush.bf16.msra.mxu1 %v733_v45  ;;  %v748_v29 = vld [vmem:[%s982_s4] ss:$0 sm:$0xff] }
  0x39   : > { %v465_v37 = vmul.f32 %v750_v19, %v464_v31 }
  0x3a   : > { %v438_v39 = vadd.f32 %v437_v33, %v436_v26  ;;  %v457_v40 = vadd.f32 %v456_v34, %v455_v27 }
  0x3b   : > { %v466_v44 = vadd.f32 %v750_v19, %v465_v37 }
  0x3c   : > { %v439_v46 = vrot.slane %v438_v39, 1  ;;  %v458_v47 = vrot.slane %v457_v40, 2  ;;  %618 = vmatpush.bf16.msra.mxu1 %v732_v57 }
  0x3d   : > { %v468_v48 = vsel %vm467_vm1, %v750_v19, %v466_v44 }
  0x3e   : > { %v440_v49 = vadd.f32 %v439_v46, %v438_v39  ;;  %v459_v50 = vadd.f32 %v458_v47, %v457_v40  ;;  %v469_v51 = vmul.f32 %v468_v48, %v314_v35  ;;  %v470_v52 = vmul.f32 %v468_v48, %v335_v36 }
  0x3f   : > { %v471_v53 = vmul.f32 %v468_v48, %v356_v38  ;;  %v472_v54 = vmul.f32 %v468_v48, %v377_v41  ;;  %v473_v55 = vmul.f32 %v468_v48, %v398_v42  ;;  %v474_v56 = vmul.f32 %v468_v48, %v419_v43 }
  0x40   : > { %v460_v58 = vrot.slane %v459_v50, 1  ;;  %v475_v59 = vmul.f32 %v468_v48, %v440_v49  ;;  %v477_v60 = vpack.c.bf16 %v469_v51, %v469_v51  ;;  %v478_v61 = vpack.c.bf16 %v470_v52, %v470_v52  ;;  %619 = vmatpush.bf16.msra.mxu1 %v731_v9 }
  0x41   : > { %v479_v62 = vpack.c.bf16 %v471_v53, %v471_v53  ;;  %v480_v63 = vpack.c.bf16 %v472_v54, %v472_v54  ;;  %v481_v0 = vpack.c.bf16 %v473_v55, %v473_v55  ;;  %v482_v1 = vpack.c.bf16 %v474_v56, %v474_v56 }
  0x42   : > { %v461_v2 = vadd.f32 %v460_v58, %v459_v50  ;;  %v483_v3 = vpack.c.bf16 %v475_v59, %v475_v59  ;;  %v499_v4 = vunpack.c.l.b16 %v477_v60  ;;  %v500_v5 = vunpack.c.l.b16 %v478_v61 }
  0x43   : > { %v501_v6 = vunpack.c.l.b16 %v479_v62  ;;  %v502_v7 = vunpack.c.l.b16 %v480_v63  ;;  %v503_v8 = vunpack.c.l.b16 %v481_v0  ;;  %v504_v11 = vunpack.c.l.b16 %v482_v1 }
  0x44   : > { %v476_v10 = vmul.f32 %v468_v48, %v461_v2  ;;  %v508_v12 = vsel %vm507_vm2, %v500_v5, %v499_v4  ;;  %v505_v13 = vunpack.c.l.b16 %v483_v3  ;;  %620 = vmatpush.bf16.msra.mxu1 %v730_v23 }
  0x45   : > { %v510_v14 = vsel %vm509_vm3, %v501_v6, %v508_v12 }
  0x46   : > { %v484_v15 = vpack.c.bf16 %v476_v10, %v476_v10  ;;  %v512_v16 = vsel %vm511_vm4, %v502_v7, %v510_v14 }
  0x47   : > { %v514_v17 = vsel %vm513_vm5, %v503_v8, %v512_v16 }
  0x48   : > { %v506_v18 = vunpack.c.l.b16 %v484_v15  ;;  %v516_v19 = vsel %vm515_vm6, %v504_v11, %v514_v17 }
  0x49   : > { %v518_v20 = vsel %vm517_vm7, %v505_v13, %v516_v19 }
  0x4a   : > { %v520_v22 = vsel %vm519_vm8, %v506_v18, %v518_v20 }
  0x4b   : > { %v521_v21 = vpack.c.b16 %v520_v22, %v520_v22 }
  0x4d   : > { %693 = vmatmul.msk.bf16.vlgmr.msra.gmra.mxu0 %vm293_vm0, %v521_v21 }
  0xca   : > { %v540_v25 = vpop.f32.mrf.mxu0 }
  0xcb   : > { %v541_v26 = vadd.f32 %v747_v24, %v540_v25 }
  0xcd   : > { %v544_v27 = vpack.c.bf16 %v541_v26, %v541_v26 }
  0xcf   : > { %621 = vmatmul.bf16.vlgmr.msra.gmra.mxu1 %v544_v27 }
  0xd2   : > { %v542_v28 = vpop.f32.mrf.mxu0 }
 0x14c   : > { %v622_v30 = vpop.f32.mrf.mxu1 }
 0x14d   : > { %v623_v31 = vadd.f32 %v748_v29, %v622_v30 }
 0x14f   : > { %626 = vst [vmem:[%s227_s27] sm:$0xff] %v623_v31 }
 0x154   : > { %v624_v32 = vpop.f32.mrf.mxu1 }
 0x155 PF: > { %s15_s18 = sadd.s32 1, %s757_s18  }
 0x156   : > { %p12_p5 = scmp.ge.s32.totalorder %s15_s18, 4  }
 0x158   :  { %14 = sbr.rel (!%p12_p5) target bundleno = 1 (0x1), region = 70 }

// kernel: eccl_single_forward.5
= control target key start
LH: loop header
LB: loop body
LE: loop exit
PB: predicated region body
PF: predicated region fallthrough
CT: control target
= control target key end

     0   :  { %s366_s0 = inlined_call_operand.<no memory space> [shape: f32[1,1], index: 0, kind: input, shape index: {}]   ;;  %s367_s1 = inlined_call_operand.vmem [shape: f32[16,128], index: 1, kind: input, shape index: {}]   ;;  %s368_s2 = inlined_call_operand.vmem [shape: f32[16,128], index: 2, kind: input, shape index: {}]   ;;  %s369_s3 = inlined_call_operand.hbm [shape: f32[1,1], index: 3, kind: output, shape index: {}]  }
   0x1   :  { %v20_v0 = vld [vmem:[%s368_s2 + $0x8] sm:$0xff]  ;;  %v332_v1 = vld [vmem:[%s367_s1] sm:$0xff] }
   0x2   :  { %v52_v2 = vmul.f32 %v20_v0, %v20_v0  ;;  %v21_v3 = vmul.f32 %v332_v1, %v332_v1 }
   0x3   :  { %9 = vsyncpa [#allocation4], 0  ;;  %v19_v4 = vld [vmem:[%s368_s2] sm:$0xff]  ;;  %v342_v5 = vld [vmem:[%s367_s1 + $0x8] sm:$0xff]  ;;  %v351_v50 = vstv %s366_s0  ;;  %vm115_vm12 = vcmask 130048   ;;  %vm200_vm13 = vcmask 122880  }
   0x4   :  { %55 = vadd.xlane.f32.xlu0 %v52_v2  ;;  %23 = vadd.xlane.f32.xlu1 %v21_v3  ;;  %v51_v6 = vmul.f32 %v19_v4, %v19_v4  ;;  %v22_v7 = vmul.f32 %v342_v5, %v342_v5  ;;  %vm165_vm14 = vcmask 7168   ;;  %s305_s27 = smov [#allocation3]   ;;  %s233_s5 = sshll.u32 %s369_s3, 4  ;;  %s234_s5 = int_to_ptr.hbm [resolvable:$true] %s233_s5 }
   0x5   :  { %s231_s28 = sshll.u32 %s305_s27, 4  ;;  %s232_s28 = int_to_ptr.vmem [resolvable:$true] %s231_s28 }
   0xc   :  { %53 = vadd.xlane.f32.xlu0 %v51_v6  ;;  %25 = vadd.xlane.f32.xlu1 %v22_v7 }
  0x77   :  { %v56_v8 = vpop.xlane.xlu0 %55  ;;  %v24_v9 = vpop.xlane.xlu1 %23 }
  0x78   :  { %v58_v10 = vadd.f32 1e-12, %v56_v8  ;;  %v27_v11 = vadd.f32 1e-12, %v24_v9 }
  0x7a   :  { %254 = vrsqrt.f32 %v58_v10  ;;  %vm75_vm1 = vweird.f32 %v58_v10  ;;  %vm35_vm3 = vweird.f32 %v27_v11 }
  0x7b   :  { %256 = vrsqrt.f32 %v27_v11 }
  0x7f   :  { %v54_v12 = vpop.xlane.xlu0 %53  ;;  %v26_v13 = vpop.xlane.xlu1 %25 }
  0x80   :  { %v255_v14 = vpop.eup %254  ;;  %v57_v15 = vadd.f32 1e-12, %v54_v12  ;;  %v28_v16 = vadd.f32 1e-12, %v26_v13 }
  0x81   :  { %v257_v17 = vpop.eup %256  ;;  %v70_v18 = vmul.f32 %v255_v14, %v58_v10  ;;  %vm76_vm0 = vweird.f32 %v255_v14 }
  0x82   :  { %v30_v19 = vmul.f32 %v257_v17, %v27_v11  ;;  %258 = vrsqrt.f32 %v57_v15  ;;  %vm77_vm2 = vmor %vm75_vm1, %vm76_vm0  ;;  %vm36_vm4 = vweird.f32 %v257_v17  ;;  %vm45_vm6 = vweird.f32 %v28_v16 }
  0x83   :  { %v71_v20 = vmul.f32 %v255_v14, %v70_v18  ;;  %260 = vrsqrt.f32 %v28_v16  ;;  %vm37_vm7 = vmor %vm35_vm3, %vm36_vm4  ;;  %vm65_vm9 = vweird.f32 %v57_v15  ;;  %vm224_vm0 = vcmask 0  }
  0x84   :  { %v31_v21 = vmul.f32 %v257_v17, %v30_v19 }
  0x85   :  { %v72_v22 = vmul.f32 0.5, %v71_v20 }
  0x86   :  { %v32_v23 = vmul.f32 0.5, %v31_v21 }
  0x87   :  { %v73_v24 = vsub.f32 1.5, %v72_v22 }
  0x88   :  { %v259_v25 = vpop.eup %258  ;;  %v33_v27 = vsub.f32 1.5, %v32_v23 }
  0x89   :  { %v261_v26 = vpop.eup %260  ;;  %v60_v28 = vmul.f32 %v259_v25, %v57_v15  ;;  %v74_v29 = vmul.f32 %v255_v14, %v73_v24  ;;  %vm66_vm5 = vweird.f32 %v259_v25 }
  0x8a   :  { %v40_v30 = vmul.f32 %v261_v26, %v28_v16  ;;  %v34_v36 = vmul.f32 %v257_v17, %v33_v27  ;;  %vm46_vm8 = vweird.f32 %v261_v26  ;;  %vm67_vm10 = vmor %vm65_vm9, %vm66_vm5 }
  0x8b   :  { %v61_v31 = vmul.f32 %v259_v25, %v60_v28  ;;  %v78_v32 = vsel %vm77_vm2, %v255_v14, %v74_v29  ;;  %vm47_vm11 = vmor %vm45_vm6, %vm46_vm8 }
  0x8c   :  { %v41_v33 = vmul.f32 %v261_v26, %v40_v30  ;;  %v80_v34 = vmul.f32 %v78_v32, %v20_v0  ;;  %v38_v41 = vsel %vm37_vm7, %v257_v17, %v34_v36 }
  0x8d   :  { %v62_v35 = vmul.f32 0.5, %v61_v31  ;;  %v49_v45 = vmul.f32 %v38_v41, %v332_v1 }
  0x8e   :  { %v42_v37 = vmul.f32 0.5, %v41_v33  ;;  %95 = vmatpush.xpose.msra.mxu0 %v80_v34  ;;  %242 = vmatpush.xpose.msra.mxu1 %v80_v34 }
  0x8f   :  { %v63_v38 = vsub.f32 1.5, %v62_v35 }
  0x90   :  { %v43_v39 = vsub.f32 1.5, %v42_v37 }
  0x91   :  { %v64_v40 = vmul.f32 %v259_v25, %v63_v38 }
  0x92   :  { %v44_v42 = vmul.f32 %v261_v26, %v43_v39 }
  0x93   :  { %v68_v43 = vsel %vm67_vm10, %v259_v25, %v64_v40 }
  0x94   :  { %v79_v44 = vmul.f32 %v68_v43, %v19_v4  ;;  %v48_v46 = vsel %vm47_vm11, %v261_v26, %v44_v42 }
  0x95   :  { %v50_v47 = vmul.f32 %v48_v46, %v342_v5 }
  0x96   :  { %96 = vmatpush.xpose.msra.mxu0 %v79_v44  ;;  %243 = vmatpush.xpose.msra.mxu1 %v79_v44  ;;  %v107_v48 = vmul.f32 %v79_v44, %v49_v45 }
  0x97   :  { %v108_v49 = vmul.f32 %v80_v34, %v50_v47 }
  0x99   :  { %97 = vmatmul.f32.vlgmr.msra.gmra.mxu0 %v49_v45  ;;  %100 = vmatmul.f32.vlgmr.msra.gmra.mxu1 %v50_v47  ;;  %v304_v47 = vmov 16.0  }
 0x116   :  { %v98_v51 = vpop.f32.mrf.mxu0  ;;  %v101_v52 = vpop.f32.mrf.mxu1 }
 0x117   :  { %v105_v53 = vmul.f32 %v351_v50, %v98_v51  ;;  %v106_v54 = vmul.f32 %v351_v50, %v101_v52 }
 0x119   :  { %v116_v55 = vsel %vm115_vm12, %v105_v53, -inf  ;;  %v119_v56 = vsel %vm115_vm12, %v106_v54, -inf }
 0x11a   :  { %117 = vmax.xlane.f32.xlu2 %v116_v55  ;;  %v140_v57 = vmax.f32 %v116_v55, %v119_v56 }
 0x11c   :  { %v141_v58 = vrot.slane %v140_v57, 4 }
 0x11e   :  { %v142_v59 = vmax.f32 %v140_v57, %v141_v58 }
 0x120   :  { %v143_v60 = vrot.slane %v142_v59, 2 }
 0x122   :  { %120 = vmax.xlane.f32.xlu2 %v119_v56  ;;  %v144_v61 = vmax.f32 %v142_v59, %v143_v60 }
 0x124   :  { %v145_v62 = vrot.slane %v144_v61, 1 }
 0x126   :  { %v146_v63 = vmax.f32 %v144_v61, %v145_v62 }
 0x128   :  { %v147_v0 = vsub.f32 %v105_v53, %v146_v63  ;;  %v148_v1 = vsub.f32 %v106_v54, %v146_v63 }
 0x12a   :  { %109 = vadd.xlane.f32.xlu2 %v107_v48  ;;  %v149_v2 = vmul.f32 1.442695, %v147_v0  ;;  %v151_v3 = vmul.f32 1.442695, %v148_v1 }
 0x12c   :  { %262 = vpow2.f32 %v149_v2 }
 0x12d   :  { %264 = vpow2.f32 %v151_v3 }
 0x132   :  { %v263_v4 = vpop.eup %262 }
 0x133   :  { %v265_v5 = vpop.eup %264  ;;  %v153_v6 = vsel %vm115_vm12, %v263_v4, 0.0 }
 0x134   :  { %v154_v7 = vsel %vm115_vm12, %v265_v5, 0.0 }
 0x135   :  { %v155_v8 = vadd.f32 %v154_v7, %v153_v6 }
 0x137   :  { %v156_v9 = vrot.slane %v155_v8, 4 }
 0x139   :  { %v157_v10 = vadd.f32 %v156_v9, %v155_v8 }
 0x13b   :  { %v158_v11 = vrot.slane %v157_v10, 2 }
 0x13d   :  { %v159_v12 = vadd.f32 %v158_v11, %v157_v10 }
 0x13f   :  { %v160_v16 = vrot.slane %v159_v12, 1 }
 0x141   :  { %v161_v17 = vadd.f32 %v160_v16, %v159_v12 }
 0x18d   :  { %v118_v13 = vpop.xlane.xlu2 %117 }
 0x18e   :  { %v122_v14 = vsub.f32 %v105_v53, %v118_v13 }
 0x190   :  { %v124_v15 = vmul.f32 1.442695, %v122_v14 }
 0x192   :  { %266 = vpow2.f32 %v124_v15 }
 0x193   :  { %268 = vlog2.f32 %v161_v17 }
 0x195   :  { %v121_v18 = vpop.xlane.xlu2 %120 }
 0x196   :  { %v123_v19 = vsub.f32 %v106_v54, %v121_v18 }
 0x198   :  { %v267_v20 = vpop.eup %266  ;;  %v126_v21 = vmul.f32 1.442695, %v123_v19 }
 0x199   :  { %v128_v22 = vsel %vm115_vm12, %v267_v20, 0.0  ;;  %v269_v23 = vpop.eup %268 }
 0x19a   :  { %270 = vpow2.f32 %v126_v21  ;;  %129 = vadd.xlane.f32.xlu0 %v128_v22  ;;  %v163_v26 = vmul.f32 0.6931472, %v269_v23 }
 0x19c   :  { %v164_v27 = vadd.f32 %v163_v26, %v146_v63 }
 0x19d   :  { %v110_v30 = vpop.xlane.xlu2 %109 }
 0x19e   :  { %v201_v28 = vsel %vm200_vm13, %v164_v27, 0.0  ;;  %v113_v31 = vmul.f32 %v110_v30, %v351_v50 }
 0x1a0   :  { %v271_v24 = vpop.eup %270  ;;  %v178_v36 = vsel %vm165_vm14, %v113_v31, 0.0 }
 0x1a1   :  { %v131_v25 = vsel %vm115_vm12, %v271_v24, 0.0 }
 0x1a2   :  { %111 = vadd.xlane.f32.xlu0 %v108_v49  ;;  %132 = vadd.xlane.f32.xlu1 %v131_v25 }
 0x1aa   :  { %202 = vadd.xlane.f32.xlu0 %v201_v28 }
 0x20d   :  { %v130_v29 = vpop.xlane.xlu0 %129 }
 0x20e   :  { %272 = vlog2.f32 %v130_v29 }
 0x214   :  { %v273_v34 = vpop.eup %272 }
 0x215   :  { %v112_v32 = vpop.xlane.xlu0 %111  ;;  %v133_v33 = vpop.xlane.xlu1 %132  ;;  %v135_v38 = vmul.f32 0.6931472, %v273_v34 }
 0x216   :  { %v114_v35 = vmul.f32 %v112_v32, %v351_v50  ;;  %274 = vlog2.f32 %v133_v33 }
 0x217   :  { %v138_v41 = vadd.f32 %v135_v38, %v118_v13  ;;  %276 = vrcp.f32 %v304_v47 }
 0x218   :  { %v179_v37 = vsel %vm165_vm14, %v114_v35, 0.0 }
 0x219   :  { %v180_v39 = vadd.f32 %v179_v37, %v178_v36  ;;  %v166_v44 = vsel %vm165_vm14, %v138_v41, 0.0 }
 0x21b   :  { %181 = vadd.xlane.f32.xlu2 %v180_v39 }
 0x21c   :  { %v275_v40 = vpop.eup %274 }
 0x21d   :  { %v137_v42 = vmul.f32 0.6931472, %v275_v40  ;;  %v203_v48 = vpop.xlane.xlu0 %202  ;;  %v277_v50 = vpop.eup %276 }
 0x21e   :  { %v204_v52 = vrot.slane %v203_v48, 4  ;;  %v192_v54 = vmul.f32 16.0, %v277_v50  ;;  %vm196_vm15 = vweird.f32 %v277_v50 }
 0x21f   :  { %v139_v43 = vadd.f32 %v137_v42, %v121_v18 }
 0x220   :  { %v205_v55 = vadd.f32 %v204_v52, %v203_v48  ;;  %v193_v58 = vsub.f32 1.0, %v192_v54 }
 0x221   :  { %v167_v45 = vsel %vm165_vm14, %v139_v43, 0.0 }
 0x222   :  { %v168_v46 = vadd.f32 %v167_v45, %v166_v44  ;;  %v206_v60 = vrot.slane %v205_v55, 2  ;;  %v194_v63 = vmul.f32 %v277_v50, %v193_v58 }
 0x224   :  { %169 = vadd.xlane.f32.xlu1 %v168_v46  ;;  %v207_v1 = vadd.f32 %v206_v60, %v205_v55  ;;  %v195_v4 = vadd.f32 %v277_v50, %v194_v63 }
 0x226   :  { %v208_v6 = vrot.slane %v207_v1, 1  ;;  %v197_v9 = vsel %vm196_vm15, %v277_v50, %v195_v4 }
 0x228   :  { %v209_v10 = vadd.f32 %v208_v6, %v207_v1 }
 0x28e   :  { %v182_v49 = vpop.xlane.xlu2 %181 }
 0x28f   :  { %v183_v51 = vrot.slane %v182_v49, 4 }
 0x291   :  { %v184_v53 = vadd.f32 %v183_v51, %v182_v49 }
 0x293   :  { %v185_v56 = vrot.slane %v184_v53, 2 }
 0x295   :  { %v186_v62 = vadd.f32 %v185_v56, %v184_v53 }
 0x297   :  { %v170_v57 = vpop.xlane.xlu1 %169  ;;  %v187_v3 = vrot.slane %v186_v62, 1 }
 0x298   :  { %v171_v59 = vrot.slane %v170_v57, 4 }
 0x299   :  { %v188_v8 = vadd.f32 %v187_v3, %v186_v62 }
 0x29a   :  { %v172_v61 = vadd.f32 %v171_v59, %v170_v57 }
 0x29c   :  { %v173_v0 = vrot.slane %v172_v61, 2 }
 0x29e   :  { %v174_v2 = vadd.f32 %v173_v0, %v172_v61 }
 0x2a0   :  { %v175_v5 = vrot.slane %v174_v2, 1 }
 0x2a2   :  { %v176_v7 = vadd.f32 %v175_v5, %v174_v2 }
 0x2a4   :  { %244 = vpush %v176_v7 }
 0x2a5   :  { %246 = vpush %v188_v8 }
 0x2a6   :  { %248 = vpush %v197_v9 }
 0x2a7   :  { %250 = vpush %v209_v10 }
 0x2d5   :  { %s245_s0 = spop %244 }
 0x2d6   :  { %s247_s20 = spop %246 }
 0x2d7   :  { %s190_s21 = ssub.f32 %s245_s0, %s247_s20  ;;  %s249_s22 = spop %248 }
 0x2d8   :  { %s251_s23 = spop %250 }
 0x2d9   :  { %s199_s24 = smul.f32 %s249_s22, %s190_s21  ;;  %s211_s25 = ssub.f32 %s251_s23, %s247_s20 }
 0x2db   :  { %s220_s26 = smul.f32 %s249_s22, %s211_s25 }
 0x2dd   :  { %s221_s29 = sadd.f32 %s220_s26, %s199_s24 }
 0x2df   :  { %s222_s6 = smul.f32 0.5, %s221_s29 }
 0x2e1   :  { %v223_v11 = vstv %s222_s6 }
 0x2e2   :  { %225 = vst.msk [vmem:[#allocation3] sm:$0x1] %vm224_vm0, %v223_v11 }
 0x2e3   :  { %236 = dma.vmem_to_hbm [thread:$0]  %s232_s28, 16, %s234_s5, [#allocation4]  }
 0x2e4   :  { %302 = dma.done.wait [#allocation4], 16  }
 0x2e5   :  { %303 = vsyncadd [#allocation4], 4294967280 }
 0x2e6   :  { %241 = vsyncpa [#allocation4], 1 }

// kernel: eccl_single_forward.3
= control target key start
LH: loop header
LB: loop body
LE: loop exit
PB: predicated region body
PF: predicated region fallthrough
CT: control target
= control target key end

     0   :  { %s1005_s24 = smov 0   ;;  %s1265_s0 = inlined_call_operand.vmem [shape: f32[16,96,16], index: 0, kind: input, shape index: {}]   ;;  %s1266_s1 = inlined_call_operand.vmem [shape: f32[16,8], index: 1, kind: input, shape index: {}]   ;;  %s1267_s2 = inlined_call_operand.vmem [shape: bf16[16,128], index: 2, kind: input, shape index: {}]   ;;  %s1268_s3 = inlined_call_operand.vmem [shape: f32[1,128], index: 3, kind: input, shape index: {}]   ;;  %s1269_s4 = inlined_call_operand.vmem [shape: bf16[8,128], index: 4, kind: input, shape index: {}]   ;;  %s1270_s5 = inlined_call_operand.vmem [shape: bf16[128,128], index: 5, kind: input, shape index: {}]   ;;  %s1271_s6 = inlined_call_operand.vmem [shape: f32[1,128], index: 6, kind: input, shape index: {}]   ;;  %s1272_s7 = inlined_call_operand.vmem [shape: f32[16,128], index: 7, kind: output, shape index: {}]  }
   0x1 LB: > { %s884_s25 = sadd.s32 4294967295, %s962_s24   ;;  %p888_p0 = scmp.ge.s32.totalorder %s962_s24, 1  ;;  %s962_s24 = sphi %s1005_s24, %s17_s24  }
   0x2   : > { %p248_p1 = scmp.lt.s32.totalorder %s962_s24, 3 }
   0x4   : > { %p249_p2 = pnand %p888_p0, %p248_p1 }
   0x5   : > { %p291_p3 = scmp.lt.s32.totalorder (!%p249_p2), %s884_s25, 1  ;;  %s889_s30 = sshll.u32 (!%p249_p2), %s884_s25, 3 }
   0x6   : > { %252 = sbr.rel (%p249_p2) target bundleno = 370 (0x172), region = 48  ;;  %p285_p4 = scmp.lt.s32.totalorder (!%p249_p2), %s889_s30, 15 }
   0xb   : > { %v713_v0 = vld [vmem:[%s1269_s4] sm:$0xf]  ;;  %vm718_vm0 = vcmask 1043456   ;;  %s1274_s25 = smov (!%p291_p3, %s884_s25), 1  ;;  %vm714_vm1 = vcmask 64512   ;;  %s1276_s30 = smov (!%p285_p4, %s889_s30), 15 }
   0xc   : > { %v933_v1 = vld [vmem:[%s1267_s2] sm:$0xff]  ;;  %v720_v2 = vsel %vm718_vm0, %v713_v0, 0  ;;  %s891_s8 = sshll.u32 %s1274_s25, 3  ;;  %s942_s12 = smul.u32 96, %s1276_s30  ;;  %vm396_vm2 = vcmask 130048   ;;  %vm674_vm4 = vcmask 1041409  }
   0xd   : > { %729 = vmatpush.bf16.msra.mxu1 %v720_v2  ;;  %705 = vmatpush.bf16.msra.mxu0 %v933_v1  ;;  %s294_s11 = scalar_lea.vmem %s1266_s1, %s891_s8  ;;  %vm676_vm5 = vcmask 1042434   ;;  %vm678_vm6 = vcmask 1043459   ;;  %vm680_vm7 = vcmask 1044484   ;;  %vm682_vm8 = vcmask 1045509   ;;  %s298_s18 = scalar_lea.vmem %s1272_s7, %s891_s8 }
   0xe   : > { %v711_v3 = vld [vmem:[%s294_s11] sm:$0xff]  ;;  %s1030_s15 = scalar_lea.vmem %s1265_s0, %s942_s12  ;;  %vm684_vm9 = vcmask 1046534   ;;  %vm686_vm10 = vcmask 1047559  }
   0xf   : > { %v712_v4 = vpack.c.bf16 %v711_v3, %v711_v3  ;;  %v300_v5 = vld [vmem:[%s1030_s15] sm:$0xff]  ;;  %v301_v6 = vld [vmem:[%s1030_s15 + $0x8] sm:$0xff]  ;;  %v302_v7 = vld [vmem:[%s1030_s15 + $0x10] sm:$0xff] }
  0x10   : > { %v303_v8 = vld [vmem:[%s1030_s15 + $0x18] sm:$0xff]  ;;  %v397_v9 = vsel %vm396_vm2, %v300_v5, 0.0  ;;  %v398_v10 = vsel %vm396_vm2, %v301_v6, 0.0  ;;  %v400_v11 = vsel %vm396_vm2, %v302_v7, 0.0  ;;  %v304_v12 = vld [vmem:[%s1030_s15 + $0x20] sm:$0xff]  ;;  %v305_v14 = vld [vmem:[%s1030_s15 + $0x28] sm:$0xff] }
  0x11   : > { %898 = vmatmul.msk.bf16.vlgmr.msra.gmra.mxu1 %vm714_vm1, %v712_v4  ;;  %v399_v13 = vadd.f32 %v398_v10, %v397_v9  ;;  %v402_v15 = vsel %vm396_vm2, %v303_v8, 0.0  ;;  %v312_v16 = vld [vmem:[%s1030_s15 + $0x60] sm:$0xff]  ;;  %v313_v17 = vld [vmem:[%s1030_s15 + $0x68] sm:$0xff]  ;;  %v314_v18 = vld [vmem:[%s1030_s15 + $0x70] sm:$0xff]  ;;  %v404_v21 = vsel %vm396_vm2, %v304_v12, 0.0  ;;  %v406_v30 = vsel %vm396_vm2, %v305_v14, 0.0 }
  0x12   : > { %v315_v20 = vld [vmem:[%s1030_s15 + $0x78] sm:$0xff]  ;;  %v426_v22 = vsel %vm396_vm2, %v312_v16, 0.0  ;;  %v427_v23 = vsel %vm396_vm2, %v313_v17, 0.0  ;;  %v429_v24 = vsel %vm396_vm2, %v314_v18, 0.0  ;;  %v306_v25 = vld [vmem:[%s1030_s15 + $0x30] sm:$0xff]  ;;  %v316_v26 = vld [vmem:[%s1030_s15 + $0x80] sm:$0xff] }
  0x13   : > { %v401_v19 = vadd.f32 %v400_v11, %v399_v13  ;;  %v428_v28 = vadd.f32 %v427_v23, %v426_v22  ;;  %v317_v29 = vld [vmem:[%s1030_s15 + $0x88] sm:$0xff]  ;;  %v431_v31 = vsel %vm396_vm2, %v315_v20, 0.0  ;;  %v324_v32 = vld [vmem:[%s1030_s15 + $0xc0] sm:$0xff]  ;;  %v326_v34 = vld [vmem:[%s1030_s15 + $0xd0] sm:$0xff]  ;;  %v408_v38 = vsel %vm396_vm2, %v306_v25, 0.0 }
  0x14   : > { %v325_v33 = vld [vmem:[%s1030_s15 + $0xc8] sm:$0xff]  ;;  %v327_v37 = vld [vmem:[%s1030_s15 + $0xd8] sm:$0xff]  ;;  %v433_v39 = vsel %vm396_vm2, %v316_v26, 0.0  ;;  %v455_v40 = vsel %vm396_vm2, %v324_v32, 0.0  ;;  %v318_v42 = vld [vmem:[%s1030_s15 + $0x90] sm:$0xff]  ;;  %v458_v46 = vsel %vm396_vm2, %v326_v34, 0.0 }
  0x15   : > { %v403_v27 = vadd.f32 %v402_v15, %v401_v19  ;;  %v430_v36 = vadd.f32 %v429_v24, %v428_v28  ;;  %v307_v41 = vld [vmem:[%s1030_s15 + $0x38] sm:$0xff]  ;;  %v456_v45 = vsel %vm396_vm2, %v325_v33, 0.0  ;;  %v328_v48 = vld [vmem:[%s1030_s15 + $0xe0] sm:$0xff]  ;;  %v435_v49 = vsel %vm396_vm2, %v317_v29, 0.0  ;;  %v337_v52 = vld [vmem:[%s1030_s15 + $0x128] sm:$0xff] }
  0x16   : > { %v319_v47 = vld [vmem:[%s1030_s15 + $0x98] sm:$0xff]  ;;  %v457_v50 = vadd.f32 %v456_v45, %v455_v40  ;;  %v336_v51 = vld [vmem:[%s1030_s15 + $0x120] sm:$0xff]  ;;  %v338_v53 = vld [vmem:[%s1030_s15 + $0x130] sm:$0xff]  ;;  %v460_v56 = vsel %vm396_vm2, %v327_v37, 0.0  ;;  %v410_v58 = vsel %vm396_vm2, %v307_v41, 0.0  ;;  %v437_v59 = vsel %vm396_vm2, %v318_v42, 0.0 }
  0x17   : > { %v405_v35 = vadd.f32 %v404_v21, %v403_v27  ;;  %v432_v44 = vadd.f32 %v431_v31, %v430_v36  ;;  %v329_v57 = vld [vmem:[%s1030_s15 + $0xe8] sm:$0xff]  ;;  %v308_v61 = vld [vmem:[%s1030_s15 + $0x40] sm:$0xff]  ;;  %v339_v62 = vld [vmem:[%s1030_s15 + $0x138] sm:$0xff]  ;;  %v462_v0 = vsel %vm396_vm2, %v328_v48, 0.0  ;;  %v484_v1 = vsel %vm396_vm2, %v336_v51, 0.0 }
  0x18   : > { %v459_v60 = vadd.f32 %v458_v46, %v457_v50  ;;  %v330_v2 = vld [vmem:[%s1030_s15 + $0xf0] sm:$0xff]  ;;  %v439_v3 = vsel %vm396_vm2, %v319_v47, 0.0  ;;  %v485_v5 = vsel %vm396_vm2, %v337_v52, 0.0  ;;  %v487_v6 = vsel %vm396_vm2, %v338_v53, 0.0  ;;  %v309_v7 = vld [vmem:[%s1030_s15 + $0x48] sm:$0xff]  ;;  %v320_v8 = vld [vmem:[%s1030_s15 + $0xa0] sm:$0xff] }
  0x19   : > { %v407_v43 = vadd.f32 %v406_v30, %v405_v35  ;;  %v434_v55 = vadd.f32 %v433_v39, %v432_v44  ;;  %v340_v9 = vld [vmem:[%s1030_s15 + $0x140] sm:$0xff]  ;;  %v464_v12 = vsel %vm396_vm2, %v329_v57, 0.0  ;;  %v486_v13 = vadd.f32 %v485_v5, %v484_v1  ;;  %v331_v14 = vld [vmem:[%s1030_s15 + $0xf8] sm:$0xff]  ;;  %v341_v19 = vld [vmem:[%s1030_s15 + $0x148] sm:$0xff] }
  0x1a   : > { %v461_v4 = vadd.f32 %v460_v56, %v459_v60  ;;  %v348_v15 = vld [vmem:[%s1030_s15 + $0x180] sm:$0xff]  ;;  %v412_v16 = vsel %vm396_vm2, %v308_v61, 0.0  ;;  %v489_v18 = vsel %vm396_vm2, %v339_v62, 0.0  ;;  %v349_v20 = vld [vmem:[%s1030_s15 + $0x188] sm:$0xff]  ;;  %v350_v21 = vld [vmem:[%s1030_s15 + $0x190] sm:$0xff]  ;;  %v466_v23 = vsel %vm396_vm2, %v330_v2, 0.0 }
  0x1b   : > { %v409_v54 = vadd.f32 %v408_v38, %v407_v43  ;;  %v436_v63 = vadd.f32 %v435_v49, %v434_v55  ;;  %v488_v24 = vadd.f32 %v487_v6, %v486_v13  ;;  %v414_v25 = vsel %vm396_vm2, %v309_v7, 0.0  ;;  %v321_v29 = vld [vmem:[%s1030_s15 + $0xa8] sm:$0xff]  ;;  %v342_v30 = vld [vmem:[%s1030_s15 + $0x150] sm:$0xff]  ;;  %v351_v31 = vld [vmem:[%s1030_s15 + $0x198] sm:$0xff] }
  0x1c   : > { %v463_v17 = vadd.f32 %v462_v0, %v461_v4  ;;  %v441_v26 = vsel %vm396_vm2, %v320_v8, 0.0  ;;  %v491_v28 = vsel %vm396_vm2, %v340_v9, 0.0  ;;  %v468_v33 = vsel %vm396_vm2, %v331_v14, 0.0  ;;  %v310_v36 = vld [vmem:[%s1030_s15 + $0x50] sm:$0xff]  ;;  %v332_v37 = vld [vmem:[%s1030_s15 + $0x100] sm:$0xff]  ;;  %v311_v42 = vld [vmem:[%s1030_s15 + $0x58] sm:$0xff] }
  0x1d   : > { %v411_v10 = vadd.f32 %v410_v58, %v409_v54  ;;  %v438_v11 = vadd.f32 %v437_v59, %v436_v63  ;;  %v490_v34 = vadd.f32 %v489_v18, %v488_v24  ;;  %v513_v35 = vsel %vm396_vm2, %v348_v15, 0.0  ;;  %v343_v43 = vld [vmem:[%s1030_s15 + $0x158] sm:$0xff]  ;;  %v352_v44 = vld [vmem:[%s1030_s15 + $0x1a0] sm:$0xff]  ;;  %v322_v48 = vld [vmem:[%s1030_s15 + $0xb0] sm:$0xff] }
  0x1e   : > { %v465_v27 = vadd.f32 %v464_v12, %v463_v17  ;;  %v493_v39 = vsel %vm396_vm2, %v341_v19, 0.0  ;;  %v514_v40 = vsel %vm396_vm2, %v349_v20, 0.0  ;;  %v516_v41 = vsel %vm396_vm2, %v350_v21, 0.0  ;;  %v333_v53 = vld [vmem:[%s1030_s15 + $0x108] sm:$0xff]  ;;  %v344_v54 = vld [vmem:[%s1030_s15 + $0x160] sm:$0xff]  ;;  %v323_v60 = vld [vmem:[%s1030_s15 + $0xb8] sm:$0xff] }
  0x1f   : > { %v440_v22 = vadd.f32 %v439_v3, %v438_v11  ;;  %v413_v32 = vadd.f32 %v412_v16, %v411_v10  ;;  %v492_v46 = vadd.f32 %v491_v28, %v490_v34  ;;  %v515_v47 = vadd.f32 %v514_v40, %v513_v35  ;;  %v353_v55 = vld [vmem:[%s1030_s15 + $0x1a8] sm:$0xff]  ;;  %v360_v61 = vld [vmem:[%s1030_s15 + $0x1e0] sm:$0xff]  ;;  %v354_v3 = vld [vmem:[%s1030_s15 + $0x1b0] sm:$0xff] }
  0x20   : > { %v467_v38 = vadd.f32 %v466_v23, %v465_v27  ;;  %v443_v49 = vsel %vm396_vm2, %v321_v29, 0.0  ;;  %v495_v51 = vsel %vm396_vm2, %v342_v30, 0.0  ;;  %v518_v52 = vsel %vm396_vm2, %v351_v31, 0.0  ;;  %v345_v2 = vld [vmem:[%s1030_s15 + $0x168] sm:$0xff]  ;;  %v362_v9 = vld [vmem:[%s1030_s15 + $0x1f0] sm:$0xff]  ;;  %v355_v15 = vld [vmem:[%s1030_s15 + $0x1b8] sm:$0xff] }
  0x21   : > { %v442_v45 = vadd.f32 %v441_v26, %v440_v22  ;;  %v415_v56 = vadd.f32 %v414_v25, %v413_v32  ;;  %v470_v57 = vsel %vm396_vm2, %v332_v37, 0.0  ;;  %v494_v58 = vadd.f32 %v493_v39, %v492_v46  ;;  %v361_v4 = vld [vmem:[%s1030_s15 + $0x1e8] sm:$0xff]  ;;  %v334_v14 = vld [vmem:[%s1030_s15 + $0x110] sm:$0xff]  ;;  %v363_v20 = vld [vmem:[%s1030_s15 + $0x1f8] sm:$0xff] }
  0x22   : > { %v469_v50 = vadd.f32 %v468_v33, %v467_v38  ;;  %v517_v59 = vadd.f32 %v516_v41, %v515_v47  ;;  %v416_v62 = vsel %vm396_vm2, %v310_v36, 0.0  ;;  %v418_v63 = vsel %vm396_vm2, %v311_v42, 0.0  ;;  %v346_v25 = vld [vmem:[%s1030_s15 + $0x170] sm:$0xff]  ;;  %v356_v26 = vld [vmem:[%s1030_s15 + $0x1c0] sm:$0xff]  ;;  %v335_v31 = vld [vmem:[%s1030_s15 + $0x118] sm:$0xff] }
  0x23   : > { %v497_v0 = vsel %vm396_vm2, %v343_v43, 0.0  ;;  %v520_v1 = vsel %vm396_vm2, %v352_v44, 0.0  ;;  %v444_v5 = vadd.f32 %v443_v49, %v442_v45  ;;  %v445_v6 = vsel %vm396_vm2, %v322_v48, 0.0  ;;  %v364_v32 = vld [vmem:[%s1030_s15 + $0x200] sm:$0xff]  ;;  %v347_v37 = vld [vmem:[%s1030_s15 + $0x178] sm:$0xff]  ;;  %v357_v38 = vld [vmem:[%s1030_s15 + $0x1c8] sm:$0xff] }
  0x24   : > { %v496_v7 = vadd.f32 %v495_v51, %v494_v58  ;;  %v519_v8 = vadd.f32 %v518_v52, %v517_v59  ;;  %v471_v10 = vadd.f32 %v470_v57, %v469_v50  ;;  %v472_v11 = vsel %vm396_vm2, %v333_v53, 0.0  ;;  %v365_v43 = vld [vmem:[%s1030_s15 + $0x208] sm:$0xff]  ;;  %v358_v47 = vld [vmem:[%s1030_s15 + $0x1d0] sm:$0xff]  ;;  %v359_v48 = vld [vmem:[%s1030_s15 + $0x1d8] sm:$0xff] }
  0x25   : > { %v499_v12 = vsel %vm396_vm2, %v344_v54, 0.0  ;;  %v522_v13 = vsel %vm396_vm2, %v353_v55, 0.0  ;;  %v417_v16 = vadd.f32 %v416_v62, %v415_v56  ;;  %v542_v19 = vsel %vm396_vm2, %v360_v61, 0.0  ;;  %v372_v49 = vld [vmem:[%s1030_s15 + $0x240] sm:$0xff]  ;;  %v366_v54 = vld [vmem:[%s1030_s15 + $0x210] sm:$0xff]  ;;  %v373_v55 = vld [vmem:[%s1030_s15 + $0x248] sm:$0xff] }
  0x26   : > { %v498_v17 = vadd.f32 %v497_v0, %v496_v7  ;;  %v521_v18 = vadd.f32 %v520_v1, %v519_v8  ;;  %v447_v21 = vsel %vm396_vm2, %v323_v60, 0.0  ;;  %v501_v22 = vsel %vm396_vm2, %v345_v2, 0.0  ;;  %v374_v60 = vld [vmem:[%s1030_s15 + $0x250] sm:$0xff]  ;;  %v367_v1 = vld [vmem:[%s1030_s15 + $0x218] sm:$0xff] }
  0x27   : > { %v524_v23 = vsel %vm396_vm2, %v354_v3, 0.0  ;;  %v543_v24 = vsel %vm396_vm2, %v361_v4, 0.0  ;;  %v446_v27 = vadd.f32 %v445_v6, %v444_v5  ;;  %v545_v30 = vsel %vm396_vm2, %v362_v9, 0.0  ;;  %v375_v2 = vld [vmem:[%s1030_s15 + $0x258] sm:$0xff] }
  0x28   : > { %v500_v28 = vadd.f32 %v499_v12, %v498_v17  ;;  %v523_v29 = vadd.f32 %v522_v13, %v521_v18  ;;  %v473_v33 = vadd.f32 %v472_v11, %v471_v10  ;;  %v474_v34 = vsel %vm396_vm2, %v334_v14, 0.0  ;;  %v368_v11 = vld [vmem:[%s1030_s15 + $0x220] sm:$0xff] }
  0x29   : > { %v526_v35 = vsel %vm396_vm2, %v355_v15, 0.0  ;;  %v544_v36 = vadd.f32 %v543_v24, %v542_v19  ;;  %v419_v39 = vadd.f32 %v418_v63, %v417_v16  ;;  %v547_v42 = vsel %vm396_vm2, %v363_v20, 0.0  ;;  %v376_v12 = vld [vmem:[%s1030_s15 + $0x260] sm:$0xff] }
  0x2a   : > { %v502_v40 = vadd.f32 %v501_v22, %v500_v28  ;;  %v525_v41 = vadd.f32 %v524_v23, %v523_v29  ;;  %v503_v44 = vsel %vm396_vm2, %v346_v25, 0.0  ;;  %v528_v45 = vsel %vm396_vm2, %v356_v26, 0.0  ;;  %v377_v22 = vld [vmem:[%s1030_s15 + $0x268] sm:$0xff]  ;;  %v370_v25 = vld [vmem:[%s1030_s15 + $0x230] sm:$0xff]  ;;  %v384_v26 = vld [vmem:[%s1030_s15 + $0x2a0] sm:$0xff] }
  0x2b   : > { %v546_v46 = vadd.f32 %v545_v30, %v544_v36  ;;  %v448_v50 = vadd.f32 %v447_v21, %v446_v27  ;;  %v476_v51 = vsel %vm396_vm2, %v335_v31, 0.0  ;;  %v549_v53 = vsel %vm396_vm2, %v364_v32, 0.0  ;;  %v369_v21 = vld [vmem:[%s1030_s15 + $0x228] sm:$0xff]  ;;  %v378_v30 = vld [vmem:[%s1030_s15 + $0x270] sm:$0xff] }
  0x2c   : > { %v527_v52 = vadd.f32 %v526_v35, %v525_v41  ;;  %v475_v56 = vadd.f32 %v474_v34, %v473_v33  ;;  %v505_v57 = vsel %vm396_vm2, %v347_v37, 0.0  ;;  %v530_v58 = vsel %vm396_vm2, %v357_v38, 0.0  ;;  %v385_v31 = vld [vmem:[%s1030_s15 + $0x2a8] sm:$0xff]  ;;  %v386_v32 = vld [vmem:[%s1030_s15 + $0x2b0] sm:$0xff] }
  0x2d   : > { %v548_v59 = vadd.f32 %v547_v42, %v546_v46  ;;  %v420_v61 = vrot.slane %v419_v39, 4  ;;  %v504_v62 = vadd.f32 %v503_v44, %v502_v40  ;;  %v551_v0 = vsel %vm396_vm2, %v365_v43, 0.0  ;;  %v371_v42 = vld [vmem:[%s1030_s15 + $0x238] sm:$0xff] }
  0x2e   : > { %v529_v63 = vadd.f32 %v528_v45, %v527_v52  ;;  %v532_v3 = vsel %vm396_vm2, %v358_v47, 0.0  ;;  %v534_v4 = vsel %vm396_vm2, %v359_v48, 0.0  ;;  %v571_v6 = vsel %vm396_vm2, %v372_v49, 0.0  ;;  %v379_v43 = vld [vmem:[%s1030_s15 + $0x278] sm:$0xff]  ;;  %v380_v52 = vld [vmem:[%s1030_s15 + $0x280] sm:$0xff] }
  0x2f   : > { %v550_v5 = vadd.f32 %v549_v53, %v548_v59  ;;  %v449_v7 = vrot.slane %v448_v50, 4  ;;  %v553_v9 = vsel %vm396_vm2, %v366_v54, 0.0  ;;  %v572_v10 = vsel %vm396_vm2, %v373_v55, 0.0  ;;  %v387_v44 = vld [vmem:[%s1030_s15 + $0x2b8] sm:$0xff]  ;;  %v388_v53 = vld [vmem:[%s1030_s15 + $0x2c0] sm:$0xff] }
  0x30   : > { %v531_v8 = vadd.f32 %v530_v58, %v529_v63  ;;  %v477_v13 = vadd.f32 %v476_v51, %v475_v56  ;;  %v573_v15 = vadd.f32 %v572_v10, %v571_v6  ;;  %v574_v16 = vsel %vm396_vm2, %v374_v60, 0.0  ;;  %v389_v63 = vld [vmem:[%s1030_s15 + $0x2c8] sm:$0xff] }
  0x31   : > { %v552_v14 = vadd.f32 %v551_v0, %v550_v5  ;;  %v506_v17 = vadd.f32 %v505_v57, %v504_v62  ;;  %v555_v19 = vsel %vm396_vm2, %v367_v1, 0.0  ;;  %v576_v20 = vsel %vm396_vm2, %v375_v2, 0.0  ;;  %v381_v62 = vld [vmem:[%s1030_s15 + $0x288] sm:$0xff] }
  0x32   : > { %v533_v18 = vadd.f32 %v532_v3, %v531_v8  ;;  %v575_v24 = vadd.f32 %v574_v16, %v573_v15  ;;  %v557_v28 = vsel %vm396_vm2, %v368_v11, 0.0  ;;  %v578_v29 = vsel %vm396_vm2, %v376_v12, 0.0  ;;  %v382_v8 = vld [vmem:[%s1030_s15 + $0x290] sm:$0xff] }
  0x33   : > { %v554_v23 = vadd.f32 %v553_v9, %v552_v14  ;;  %v421_v33 = vadd.f32 %v420_v61, %v419_v39  ;;  %v478_v34 = vrot.slane %v477_v13, 4  ;;  %v450_v37 = vadd.f32 %v449_v7, %v448_v50  ;;  %v390_v9 = vld [vmem:[%s1030_s15 + $0x2d0] sm:$0xff] }
  0x34   : > { %v535_v27 = vadd.f32 %v534_v4, %v533_v18  ;;  %v577_v36 = vadd.f32 %v576_v20, %v575_v24  ;;  %v507_v38 = vrot.slane %v506_v17, 4  ;;  %v559_v40 = vsel %vm396_vm2, %v369_v21, 0.0  ;;  %v391_v18 = vld [vmem:[%s1030_s15 + $0x2d8] sm:$0xff] }
  0x35   : > { %v556_v35 = vadd.f32 %v555_v19, %v554_v23  ;;  %v580_v41 = vsel %vm396_vm2, %v377_v22, 0.0  ;;  %v561_v46 = vsel %vm396_vm2, %v370_v25, 0.0  ;;  %v600_v39 = vsel %vm396_vm2, %v384_v26, 0.0  ;;  %v392_v26 = vld [vmem:[%s1030_s15 + $0x2e0] sm:$0xff] }
  0x36   : > { %v579_v47 = vadd.f32 %v578_v29, %v577_v36  ;;  %v536_v48 = vrot.slane %v535_v27, 4  ;;  %v582_v49 = vsel %vm396_vm2, %v378_v30, 0.0  ;;  %v601_v50 = vsel %vm396_vm2, %v385_v31, 0.0  ;;  %v393_v36 = vld [vmem:[%s1030_s15 + $0x2e8] sm:$0xff] }
  0x37   : > { %v558_v45 = vadd.f32 %v557_v28, %v556_v35  ;;  %v603_v51 = vsel %vm396_vm2, %v386_v32, 0.0  ;;  %v479_v54 = vadd.f32 %v478_v34, %v477_v13  ;;  %v602_v57 = vadd.f32 %v601_v50, %v600_v39 }
  0x38   : > { %v581_v56 = vadd.f32 %v580_v41, %v579_v47  ;;  %v508_v58 = vadd.f32 %v507_v38, %v506_v17  ;;  %v563_v59 = vsel %vm396_vm2, %v371_v42, 0.0  ;;  %v584_v60 = vsel %vm396_vm2, %v379_v43, 0.0  ;;  %v383_v17 = vld [vmem:[%s1030_s15 + $0x298] sm:$0xff] }
  0x39   : > { %v560_v55 = vadd.f32 %v559_v40, %v558_v45  ;;  %v605_v61 = vsel %vm396_vm2, %v387_v44, 0.0  ;;  %v422_v0 = vrot.slane %v421_v33, 2  ;;  %v604_v3 = vadd.f32 %v603_v51, %v602_v57 }
  0x3a   : > { %v583_v2 = vadd.f32 %v582_v49, %v581_v56  ;;  %v451_v4 = vrot.slane %v450_v37, 2  ;;  %v537_v5 = vadd.f32 %v536_v48, %v535_v27  ;;  %v586_v6 = vsel %vm396_vm2, %v380_v52, 0.0  ;;  %v940_v52 = vld [vmem:[%s1270_s5 + $0x30] sm:$0xff] }
  0x3b   : > { %v562_v1 = vadd.f32 %v561_v46, %v560_v55  ;;  %v607_v7 = vsel %vm396_vm2, %v388_v53, 0.0  ;;  %v480_v10 = vrot.slane %v479_v54, 2  ;;  %v606_v13 = vadd.f32 %v605_v61, %v604_v3  ;;  %v395_v53 = vld [vmem:[%s1030_s15 + $0x2f8] sm:$0xff] }
  0x3c   : > { %v585_v12 = vadd.f32 %v584_v60, %v583_v2  ;;  %v509_v14 = vrot.slane %v508_v58, 2  ;;  %v588_v15 = vsel %vm396_vm2, %v381_v62, 0.0  ;;  %v609_v16 = vsel %vm396_vm2, %v389_v63, 0.0 }
  0x3d   : > { %v564_v11 = vadd.f32 %v563_v59, %v562_v1  ;;  %v608_v21 = vadd.f32 %v607_v7, %v606_v13  ;;  %v964_v22 = vmov 96.0   ;;  %v538_v23 = vrot.slane %v537_v5, 2 }
  0x3e   : > { %v587_v20 = vadd.f32 %v586_v6, %v585_v12  ;;  %954 = vrcp.f32 %v964_v22  ;;  %v590_v24 = vsel %vm396_vm2, %v382_v8, 0.0  ;;  %v611_v25 = vsel %vm396_vm2, %v390_v9, 0.0 }
  0x3f   : > { %v565_v19 = vrot.slane %v564_v11, 4  ;;  %v423_v27 = vadd.f32 %v422_v0, %v421_v33  ;;  %v610_v30 = vadd.f32 %v609_v16, %v608_v21  ;;  %v452_v31 = vadd.f32 %v451_v4, %v450_v37  ;;  %v941_v33 = vld [vmem:[%s1270_s5 + $0x38] sm:$0xff]  ;;  %v394_v37 = vld [vmem:[%s1030_s15 + $0x2f0] sm:$0xff]  ;;  %v939_v4 = vld [vmem:[%s1270_s5 + $0x28] sm:$0xff] }
  0x40   : > { %v589_v29 = vadd.f32 %v588_v15, %v587_v20  ;;  %v481_v32 = vadd.f32 %v480_v10, %v479_v54  ;;  %v592_v34 = vsel %vm396_vm2, %v383_v17, 0.0  ;;  %v613_v35 = vsel %vm396_vm2, %v391_v18, 0.0  ;;  %805 = vmatpush.bf16.msra.mxu2 %v941_v33  ;;  %v938_v15 = vld [vmem:[%s1270_s5 + $0x20] sm:$0xff] }
  0x41   : > { %v566_v28 = vadd.f32 %v565_v19, %v564_v11  ;;  %v510_v38 = vadd.f32 %v509_v14, %v508_v58  ;;  %v612_v42 = vadd.f32 %v611_v25, %v610_v30  ;;  %v539_v43 = vadd.f32 %v538_v23, %v537_v5 }
  0x42   : > { %v591_v41 = vadd.f32 %v590_v24, %v589_v29  ;;  %v615_v44 = vsel %vm396_vm2, %v392_v26, 0.0  ;;  %v424_v48 = vrot.slane %v423_v27, 1  ;;  %v453_v49 = vrot.slane %v452_v31, 1 }
  0x43   : > { %v567_v40 = vrot.slane %v566_v28, 2  ;;  %v614_v39 = vadd.f32 %v613_v35, %v612_v42  ;;  %v617_v50 = vsel %vm396_vm2, %v393_v36, 0.0  ;;  %v482_v54 = vrot.slane %v481_v32, 1 }
  0x44   : > { %v955_v45 = vpop.eup %954  ;;  %v593_v47 = vadd.f32 %v592_v34, %v591_v41  ;;  %v511_v55 = vrot.slane %v510_v38, 1  ;;  %v540_v58 = vrot.slane %v539_v43, 1  ;;  %v619_v60 = vsel %vm396_vm2, %v394_v37, 0.0  ;;  %806 = vmatpush.bf16.msra.mxu2 %v940_v52 }
  0x45   : > { %v568_v46 = vadd.f32 %v567_v40, %v566_v28  ;;  %v630_v51 = vmul.f32 96.0, %v955_v45  ;;  %v616_v57 = vadd.f32 %v615_v44, %v614_v39  ;;  %v425_v0 = vadd.f32 %v424_v48, %v423_v27 }
  0x46   : > { %v594_v56 = vrot.slane %v593_v47, 4  ;;  %v454_v1 = vadd.f32 %v453_v49, %v452_v31  ;;  %v621_v2 = vsel %vm396_vm2, %v395_v53, 0.0  ;;  %v483_v5 = vadd.f32 %v482_v54, %v481_v32  ;;  %v937_v32 = vld [vmem:[%s1270_s5 + $0x18] sm:$0xff] }
  0x47   : > { %v569_v59 = vrot.slane %v568_v46, 1  ;;  %v631_v61 = vsub.f32 1.0, %v630_v51  ;;  %v618_v63 = vadd.f32 %v617_v50, %v616_v57  ;;  %vm634_vm3 = vweird.f32 %v955_v45  ;;  %v936_v57 = vld [vmem:[%s1270_s5 + $0x10] sm:$0xff] }
  0x48   : > { %v595_v62 = vadd.f32 %v594_v56, %v593_v47  ;;  %v512_v8 = vadd.f32 %v511_v55, %v510_v38  ;;  %v541_v9 = vadd.f32 %v540_v58, %v539_v43  ;;  %807 = vmatpush.bf16.msra.mxu2 %v939_v4  ;;  %v953_v4 = vld [vmem:[%s1271_s6] ss:$0 sm:$0xff] }
  0x49   : > { %v632_v3 = vmul.f32 %v955_v45, %v631_v61  ;;  %v620_v7 = vadd.f32 %v619_v60, %v618_v63  ;;  %v570_v10 = vadd.f32 %v569_v59, %v568_v46  ;;  %v935_v60 = vld [vmem:[%s1270_s5 + $0x8] sm:$0xff]  ;;  %v934_v61 = vld [vmem:[%s1270_s5] sm:$0xff] }
  0x4a   : > { %v596_v6 = vrot.slane %v595_v62, 2 }
  0x4b   : > { %v633_v11 = vadd.f32 %v955_v45, %v632_v3  ;;  %v622_v13 = vadd.f32 %v621_v2, %v620_v7 }
  0x4c   : > { %v597_v12 = vadd.f32 %v596_v6, %v595_v62  ;;  %808 = vmatpush.bf16.msra.mxu2 %v938_v15  ;;  %v952_v62 = vld [vmem:[%s1268_s3] ss:$0 sm:$0xff] }
  0x4d   : > { %v635_v14 = vsel %vm634_vm3, %v955_v45, %v633_v11  ;;  %v623_v17 = vrot.slane %v622_v13, 4 }
  0x4e   : > { %v598_v16 = vrot.slane %v597_v12, 1  ;;  %v636_v18 = vmul.f32 %v635_v14, %v425_v0  ;;  %v637_v19 = vmul.f32 %v635_v14, %v454_v1  ;;  %v638_v20 = vmul.f32 %v635_v14, %v483_v5 }
  0x4f   : > { %v639_v21 = vmul.f32 %v635_v14, %v512_v8  ;;  %v640_v22 = vmul.f32 %v635_v14, %v541_v9  ;;  %v641_v23 = vmul.f32 %v635_v14, %v570_v10  ;;  %v624_v25 = vadd.f32 %v623_v17, %v622_v13 }
  0x50   : > { %v599_v24 = vadd.f32 %v598_v16, %v597_v12  ;;  %v644_v26 = vpack.c.bf16 %v636_v18, %v636_v18  ;;  %v645_v27 = vpack.c.bf16 %v637_v19, %v637_v19  ;;  %v646_v28 = vpack.c.bf16 %v638_v20, %v638_v20  ;;  %809 = vmatpush.bf16.msra.mxu2 %v937_v32 }
  0x51   : > { %v647_v29 = vpack.c.bf16 %v639_v21, %v639_v21  ;;  %v648_v30 = vpack.c.bf16 %v640_v22, %v640_v22  ;;  %v649_v31 = vpack.c.bf16 %v641_v23, %v641_v23  ;;  %v625_v34 = vrot.slane %v624_v25, 2 }
  0x52   : > { %v642_v35 = vmul.f32 %v635_v14, %v599_v24  ;;  %v666_v36 = vunpack.c.l.b16 %v644_v26  ;;  %v667_v38 = vunpack.c.l.b16 %v645_v27  ;;  %v668_v40 = vunpack.c.l.b16 %v646_v28 }
  0x53   : > { %v669_v41 = vunpack.c.l.b16 %v647_v29  ;;  %v670_v42 = vunpack.c.l.b16 %v648_v30  ;;  %v626_v43 = vadd.f32 %v625_v34, %v624_v25  ;;  %v671_v46 = vunpack.c.l.b16 %v649_v31 }
  0x54   : > { %v675_v44 = vsel %vm674_vm4, %v667_v38, %v666_v36  ;;  %v650_v33 = vpack.c.bf16 %v642_v35, %v642_v35  ;;  %810 = vmatpush.bf16.msra.mxu2 %v936_v57 }
  0x55   : > { %v677_v45 = vsel %vm676_vm5, %v668_v40, %v675_v44  ;;  %v627_v37 = vrot.slane %v626_v43, 1 }
  0x56   : > { %v679_v47 = vsel %vm678_vm6, %v669_v41, %v677_v45  ;;  %v672_v49 = vunpack.c.l.b16 %v650_v33 }
  0x57   : > { %v681_v39 = vsel %vm680_vm7, %v670_v42, %v679_v47  ;;  %v628_v48 = vadd.f32 %v627_v37, %v626_v43 }
  0x58   : > { %v683_v51 = vsel %vm682_vm8, %v671_v46, %v681_v39  ;;  %811 = vmatpush.bf16.msra.mxu2 %v935_v60 }
  0x59   : > { %v643_v50 = vmul.f32 %v635_v14, %v628_v48  ;;  %v685_v53 = vsel %vm684_vm9, %v672_v49, %v683_v51 }
  0x5b   : > { %v651_v52 = vpack.c.bf16 %v643_v50, %v643_v50 }
  0x5c   : > { %812 = vmatpush.bf16.msra.mxu2 %v934_v61 }
  0x5d   : > { %v673_v54 = vunpack.c.l.b16 %v651_v52 }
  0x5f   : > { %v687_v55 = vsel %vm686_vm10, %v673_v54, %v685_v53 }
  0x60   : > { %v688_v56 = vpack.c.b16 %v687_v55, %v687_v55 }
  0x62   : > { %897 = vmatmul.msk.bf16.vlgmr.msra.gmra.mxu0 %vm396_vm2, %v688_v56 }
  0x8e   : > { %v731_v58 = vpop.f32.mrf.mxu1 }
  0x96   : > { %v733_v59 = vpop.f32.mrf.mxu1 }
  0xdf   : > { %v707_v63 = vpop.f32.mrf.mxu0 }
  0xe0   : > { %v708_v0 = vadd.f32 %v952_v62, %v707_v63 }
  0xe2   : > { %v735_v1 = vadd.f32 %v731_v58, %v708_v0 }
  0xe4   : > { %v736_v2 = vpack.c.bf16 %v735_v1, %v735_v1 }
  0xe6   : > { %813 = vmatmul.bf16.vlgmr.msra.gmra.mxu2 %v736_v2 }
  0xe7   : > { %v709_v3 = vpop.f32.mrf.mxu0 }
 0x169   : > { %v814_v5 = vpop.f32.mrf.mxu2 }
 0x16a   : > { %v815_v6 = vadd.f32 %v953_v4, %v814_v5 }
 0x16c   : > { %818 = vst [vmem:[%s298_s18] sm:$0xff] %v815_v6 }
 0x171   : > { %v816_v7 = vpop.f32.mrf.mxu2 }
 0x172 PF: > { %s17_s24 = sadd.s32 1, %s962_s24  }
 0x173   : > { %p14_p5 = scmp.ge.s32.totalorder %s17_s24, 4  }
 0x175   :  { %16 = sbr.rel (!%p14_p5) target bundleno = 1 (0x1), region = 81 }

</bundles_post_ra>
